<compile_context>
chip_gen: v7x
topology: tpu7x:2x2x1
jax: 0.10.0
libtpu: 0.0.40
codegen_flags: <defaults>
</compile_context>

<pallas_src>
import functools

import jax
import jax.numpy as jnp
from jax.experimental import pallas as pl
from jax.experimental.pallas import tpu as pltpu

BN_EPS = 1e-5
NEG_SLOPE = 0.2


def _res_conv_kernel(x_ref, masks_ref, w1_ref, g1_ref, b1_ref,
                     w2_ref, bias2_ref, g2_ref, b2_ref, out_ref,
                     *, n_batch, c_in, c_hid, ksize, height, width):
    # x_ref    : (N*Cin, H*W)      input, each row is one (n, c) image plane
    # masks_ref: (K*K, H*W)        per-tap border-validity masks (0/1 float32)
    # w1_ref   : (K*K*Chid, Cin)   conv1 weights, tap-major, out-channel rows
    # g1/b1    : (Chid, 1)         BN1 gamma / beta
    # w2_ref   : (K*K*Cin, Chid)   conv2 weights, tap-major, out-channel rows
    # bias2    : (Cin, 1)          conv2 bias
    # g2/b2    : (Cin, 1)          BN2 gamma / beta
    # out_ref  : (N*Cin, H*W)
    hw = height * width
    pad = (ksize - 1) // 2
    cnt = float(n_batch * hw)                       # per-channel BN count

    x_all = x_ref[...]                              # (N*Cin, HW)
    masks = masks_ref[...]                          # (K*K, HW)
    w1 = w1_ref[...]                                # (K*K*Chid, Cin)
    w2 = w2_ref[...]                                # (K*K*Cin, Chid)

    taps = [(kh - pad, kw - pad) for kh in range(ksize) for kw in range(ksize)]

    def tap_view(arr, t):
        """Each row of `arr` is an independent (n, c) plane flattened to H*W.
        Returns `arr` shifted so lane p holds the (row+dh, col+dw) neighbour,
        with out-of-image positions zeroed (lane shift on the XLU + mask)."""
        dh, dw = taps[t]
        s = dh * width + dw
        r = arr if s == 0 else pltpu.roll(arr, (-s) % hw, axis=1)
        if dh == 0 and dw == 0:
            return r                                # centre tap: mask is all-ones
        return r * masks[t:t + 1, :]

    # ---- Conv1 (no bias): per-tap channel contraction on the MXU. ----------
    acc1 = [jnp.zeros((c_hid, hw), jnp.float32) for _ in range(n_batch)]
    for t in range(ksize * ksize):
        xs = tap_view(x_all, t)                     # (N*Cin, HW)
        w_t = w1[t * c_hid:(t + 1) * c_hid, :]      # (Chid, Cin)
        for n in range(n_batch):
            acc1[n] = acc1[n] + jnp.dot(
                w_t, xs[n * c_in:(n + 1) * c_in, :],
                preferred_element_type=jnp.float32)

    # ---- BN1 (training mode, biased var, two-pass) + LeakyReLU(0.2). -------
    mu1 = sum(jnp.sum(a, axis=1, keepdims=True) for a in acc1) / cnt
    var1 = sum(jnp.sum((a - mu1) * (a - mu1), axis=1, keepdims=True)
               for a in acc1) / cnt
    scale1 = g1_ref[...] * jax.lax.rsqrt(var1 + BN_EPS)    # (Chid, 1)
    shift1 = b1_ref[...] - mu1 * scale1
    h = []
    for a in acc1:
        v = a * scale1 + shift1
        h.append(jnp.where(v > 0, v, NEG_SLOPE * v))
    h_all = jnp.concatenate(h, axis=0)                     # (N*Chid, HW)

    # ---- Conv2 (with bias): per-tap channel contraction on the MXU. --------
    acc2 = [jnp.zeros((c_in, hw), jnp.float32) for _ in range(n_batch)]
    for t in range(ksize * ksize):
        hs = tap_view(h_all, t)                     # (N*Chid, HW)
        w_t = w2[t * c_in:(t + 1) * c_in, :]        # (Cin, Chid)
        for n in range(n_batch):
            acc2[n] = acc2[n] + jnp.dot(
                w_t, hs[n * c_hid:(n + 1) * c_hid, :],
                preferred_element_type=jnp.float32)
    acc2 = [a + bias2_ref[...] for a in acc2]

    # ---- BN2 (training mode) + residual add. -------------------------------
    mu2 = sum(jnp.sum(a, axis=1, keepdims=True) for a in acc2) / cnt
    var2 = sum(jnp.sum((a - mu2) * (a - mu2), axis=1, keepdims=True)
               for a in acc2) / cnt
    scale2 = g2_ref[...] * jax.lax.rsqrt(var2 + BN_EPS)    # (Cin, 1)
    shift2 = b2_ref[...] - mu2 * scale2
    outs = []
    for n in range(n_batch):
        y = acc2[n] * scale2 + shift2
        outs.append(y + x_all[n * c_in:(n + 1) * c_in, :])
    out_ref[...] = jnp.concatenate(outs, axis=0).astype(out_ref.dtype)


def res_conv_forward(x_nchw, params):
    """x_nchw: (N, Cin, H, W) float32.  Returns (N, Cin, H, W) float32."""
    w1, g1, b1, w2, bias2, g2, b2 = (params[k] for k in
                                     ("w1", "g1", "b1", "w2", "bias2", "g2", "b2"))
    K = w1.shape[0]
    P = (K - 1) // 2
    N, Cin, H, W = x_nchw.shape
    Chid = w1.shape[-1]
    HW = H * W

    # NCHW is already spatial-minor: flatten to (N*Cin, H*W). No transpose,
    # no padded-input HBM copy.
    x2d = x_nchw.astype(jnp.float32).reshape(N * Cin, HW)

    # Per-tap border-validity masks over the flattened spatial axis.
    rows = jnp.arange(HW, dtype=jnp.int32) // W
    cols = jnp.arange(HW, dtype=jnp.int32) % W
    mask_list = []
    for kh in range(K):
        for kw in range(K):
            dh, dw = kh - P, kw - P
            m = ((rows + dh >= 0) & (rows + dh < H) &
                 (cols + dw >= 0) & (cols + dw < W))
            mask_list.append(m)
    masks = jnp.stack(mask_list).astype(jnp.float32)        # (K*K, HW)

    # Tap-major weight layout with output channels on rows, so each tap is one
    # (Cout, Cin_tap) x (Cin_tap, HW) MXU matmul. (Tiny weight-side glue.)
    w1m = jnp.transpose(w1, (0, 1, 3, 2)).reshape(K * K * Chid, Cin)
    w2m = jnp.transpose(w2, (0, 1, 3, 2)).reshape(K * K * Cin, Chid)

    kernel = functools.partial(
        _res_conv_kernel, n_batch=N, c_in=Cin, c_hid=Chid,
        ksize=K, height=H, width=W)

    out2d = pl.pallas_call(
        kernel,
        out_shape=jax.ShapeDtypeStruct((N * Cin, HW), jnp.float32),
        in_specs=[pl.BlockSpec(memory_space=pltpu.MemorySpace.VMEM)] * 9,
        out_specs=pl.BlockSpec(memory_space=pltpu.MemorySpace.VMEM),
    )(x2d, masks, w1m,
      g1.reshape(Chid, 1), b1.reshape(Chid, 1),
      w2m, bias2.reshape(Cin, 1),
      g2.reshape(Cin, 1), b2.reshape(Cin, 1))

    return out2d.reshape(N, Cin, H, W)


def res_conv_reference(x_nchw, params):
    """Pure-JAX reference (NCHW, lax conv) for correctness checking."""
    w1, g1, b1, w2, bias2, g2, b2 = (params[k] for k in
                                     ("w1", "g1", "b1", "w2", "bias2", "g2", "b2"))
    K = w1.shape[0]
    p = (K - 1) // 2
    # (K, K, Cin, Cout) -> OIHW
    w1_oihw = jnp.transpose(w1, (3, 2, 0, 1))
    w2_oihw = jnp.transpose(w2, (3, 2, 0, 1))
    dn = ("NCHW", "OIHW", "NCHW")

    def bn_train(z, gamma, beta):
        mu = jnp.mean(z, axis=(0, 2, 3), keepdims=True)
        var = jnp.var(z, axis=(0, 2, 3), keepdims=True)  # biased
        return ((z - mu) / jnp.sqrt(var + BN_EPS)
                * gamma.reshape(1, -1, 1, 1) + beta.reshape(1, -1, 1, 1))

    h = jax.lax.conv_general_dilated(x_nchw, w1_oihw, (1, 1),
                                     [(p, p), (p, p)], dimension_numbers=dn,
                                     precision="highest")
    h = bn_train(h, g1, b1)
    h = jnp.where(h > 0, h, NEG_SLOPE * h)
    y = jax.lax.conv_general_dilated(h, w2_oihw, (1, 1),
                                     [(p, p), (p, p)], dimension_numbers=dn,
                                     precision="highest")
    y = y + bias2.reshape(1, -1, 1, 1)
    y = bn_train(y, g2, b2)
    return y + x_nchw


def make_params(key, ch_in, ch_hidden, kernel):
    ks = jax.random.split(key, 7)
    return {
        # stored as (K, K, Cin, Chid) / (K, K, Chid, Cin)
        "w1": 0.2 * jax.random.normal(ks[0], (kernel, kernel, ch_in, ch_hidden), jnp.float32),
        "g1": 1.0 + 0.1 * jax.random.normal(ks[1], (ch_hidden,), jnp.float32),
        "b1": 0.1 * jax.random.normal(ks[2], (ch_hidden,), jnp.float32),
        "w2": 0.2 * jax.random.normal(ks[3], (kernel, kernel, ch_hidden, ch_in), jnp.float32),
        "bias2": 0.1 * jax.random.normal(ks[4], (ch_in,), jnp.float32),
        "g2": 1.0 + 0.1 * jax.random.normal(ks[5], (ch_in,), jnp.float32),
        "b2": 0.1 * jax.random.normal(ks[6], (ch_in,), jnp.float32),
    }


if __name__ == "__main__":
    key = jax.random.PRNGKey(0)
    k_x, k_p = jax.random.split(key)

    N, CH_IN, CH_HID, H, W, KSIZE = 2, 4, 8, 16, 16, 3
    x = jax.random.normal(k_x, (N, CH_IN, H, W), jnp.float32)   # NCHW like PyTorch
    params = make_params(k_p, CH_IN, CH_HID, KSIZE)

    out = res_conv_forward(x, params)
    out = jax.block_until_ready(out)

    ref = jax.block_until_ready(res_conv_reference(x, params))
    assert out.shape == x.shape and out.dtype == jnp.float32
    assert jnp.allclose(out, ref, rtol=2e-3, atol=2e-3), (
        f"max abs err {jnp.max(jnp.abs(out - ref))}")

    print("KERNEL_OK")
</pallas_src>

<mosaic_0001>
module attributes {stable_mosaic.version = 11 : i64} {
  func.func @_res_conv_kernel(%arg0: memref<8x256xf32, #tpu.memory_space<vmem>>, %arg1: memref<9x256xf32, #tpu.memory_space<vmem>>, %arg2: memref<72x4xf32, #tpu.memory_space<vmem>>, %arg3: memref<8x1xf32, #tpu.memory_space<vmem>>, %arg4: memref<8x1xf32, #tpu.memory_space<vmem>>, %arg5: memref<36x8xf32, #tpu.memory_space<vmem>>, %arg6: memref<4x1xf32, #tpu.memory_space<vmem>>, %arg7: memref<4x1xf32, #tpu.memory_space<vmem>>, %arg8: memref<4x1xf32, #tpu.memory_space<vmem>>, %arg9: memref<8x256xf32, #tpu.memory_space<vmem>>) attributes {dimension_semantics = [], scalar_prefetch = 0 : i64, scratch_operands = 0 : i64, tpu.core_type = #tpu.core_type<tc>} {
    %c0 = arith.constant 0 : index
    %c0_0 = arith.constant 0 : index
    %0 = vector.load %arg0[%c0, %c0_0] : memref<8x256xf32, #tpu.memory_space<vmem>>, vector<8x256xf32>
    %c0_1 = arith.constant 0 : index
    %c0_2 = arith.constant 0 : index
    %1 = vector.load %arg1[%c0_1, %c0_2] : memref<9x256xf32, #tpu.memory_space<vmem>>, vector<9x256xf32>
    %c0_3 = arith.constant 0 : index
    %c0_4 = arith.constant 0 : index
    %2 = vector.load %arg2[%c0_3, %c0_4] : memref<72x4xf32, #tpu.memory_space<vmem>>, vector<72x4xf32>
    %c0_5 = arith.constant 0 : index
    %c0_6 = arith.constant 0 : index
    %3 = vector.load %arg5[%c0_5, %c0_6] : memref<36x8xf32, #tpu.memory_space<vmem>>, vector<36x8xf32>
    %cst = arith.constant 0.000000e+00 : f32
    %4 = vector.broadcast %cst : f32 to vector<8x256xf32>
    %cst_7 = arith.constant 0.000000e+00 : f32
    %5 = vector.broadcast %cst_7 : f32 to vector<8x256xf32>
    %c17_i32 = arith.constant 17 : i32
    %6 = tpu.dynamic_rotate %0 by %c17_i32 dim 1 : vector<8x256xf32>, i32 -> vector<8x256xf32>
    %7 = vector.extract_strided_slice %1 {offsets = [0, 0], sizes = [1, 256], strides = [1, 1]} : vector<9x256xf32> to vector<1x256xf32>
    %8 = vector.broadcast %7 : vector<1x256xf32> to vector<8x256xf32>
    %9 = arith.mulf %6, %8 : vector<8x256xf32>
    %10 = vector.extract_strided_slice %2 {offsets = [0, 0], sizes = [8, 4], strides = [1, 1]} : vector<72x4xf32> to vector<8x4xf32>
    %11 = vector.extract_strided_slice %9 {offsets = [0, 0], sizes = [4, 256], strides = [1, 1]} : vector<8x256xf32> to vector<4x256xf32>
    %cst_8 = arith.constant dense<0.000000e+00> : vector<8x256xf32>
    %12 = tpu.matmul %10, %11, %cst_8 {dimension_numbers = #tpu.dot_dimension_numbers<[1], [0], [0], [1], [0, 0, 1, 1], [], []>} : vector<8x4xf32>, vector<4x256xf32>, vector<8x256xf32> -> vector<8x256xf32>
    %13 = arith.addf %4, %12 : vector<8x256xf32>
    %14 = vector.extract_strided_slice %9 {offsets = [4, 0], sizes = [4, 256], strides = [1, 1]} : vector<8x256xf32> to vector<4x256xf32>
    %cst_9 = arith.constant dense<0.000000e+00> : vector<8x256xf32>
    %15 = tpu.matmul %10, %14, %cst_9 {dimension_numbers = #tpu.dot_dimension_numbers<[1], [0], [0], [1], [0, 0, 1, 1], [], []>} : vector<8x4xf32>, vector<4x256xf32>, vector<8x256xf32> -> vector<8x256xf32>
    %16 = arith.addf %5, %15 : vector<8x256xf32>
    %c16_i32 = arith.constant 16 : i32
    %17 = tpu.dynamic_rotate %0 by %c16_i32 dim 1 : vector<8x256xf32>, i32 -> vector<8x256xf32>
    %18 = vector.extract_strided_slice %1 {offsets = [1, 0], sizes = [1, 256], strides = [1, 1]} : vector<9x256xf32> to vector<1x256xf32>
    %19 = vector.broadcast %18 : vector<1x256xf32> to vector<8x256xf32>
    %20 = arith.mulf %17, %19 : vector<8x256xf32>
    %21 = vector.extract_strided_slice %2 {offsets = [8, 0], sizes = [8, 4], strides = [1, 1]} : vector<72x4xf32> to vector<8x4xf32>
    %22 = vector.extract_strided_slice %20 {offsets = [0, 0], sizes = [4, 256], strides = [1, 1]} : vector<8x256xf32> to vector<4x256xf32>
    %cst_10 = arith.constant dense<0.000000e+00> : vector<8x256xf32>
    %23 = tpu.matmul %21, %22, %cst_10 {dimension_numbers = #tpu.dot_dimension_numbers<[1], [0], [0], [1], [0, 0, 1, 1], [], []>} : vector<8x4xf32>, vector<4x256xf32>, vector<8x256xf32> -> vector<8x256xf32>
    %24 = arith.addf %13, %23 : vector<8x256xf32>
    %25 = vector.extract_strided_slice %20 {offsets = [4, 0], sizes = [4, 256], strides = [1, 1]} : vector<8x256xf32> to vector<4x256xf32>
    %cst_11 = arith.constant dense<0.000000e+00> : vector<8x256xf32>
    %26 = tpu.matmul %21, %25, %cst_11 {dimension_numbers = #tpu.dot_dimension_numbers<[1], [0], [0], [1], [0, 0, 1, 1], [], []>} : vector<8x4xf32>, vector<4x256xf32>, vector<8x256xf32> -> vector<8x256xf32>
    %27 = arith.addf %16, %26 : vector<8x256xf32>
    %c15_i32 = arith.constant 15 : i32
    %28 = tpu.dynamic_rotate %0 by %c15_i32 dim 1 : vector<8x256xf32>, i32 -> vector<8x256xf32>
    %29 = vector.extract_strided_slice %1 {offsets = [2, 0], sizes = [1, 256], strides = [1, 1]} : vector<9x256xf32> to vector<1x256xf32>
    %30 = vector.broadcast %29 : vector<1x256xf32> to vector<8x256xf32>
    %31 = arith.mulf %28, %30 : vector<8x256xf32>
    %32 = vector.extract_strided_slice %2 {offsets = [16, 0], sizes = [8, 4], strides = [1, 1]} : vector<72x4xf32> to vector<8x4xf32>
    %33 = vector.extract_strided_slice %31 {offsets = [0, 0], sizes = [4, 256], strides = [1, 1]} : vector<8x256xf32> to vector<4x256xf32>
    %cst_12 = arith.constant dense<0.000000e+00> : vector<8x256xf32>
    %34 = tpu.matmul %32, %33, %cst_12 {dimension_numbers = #tpu.dot_dimension_numbers<[1], [0], [0], [1], [0, 0, 1, 1], [], []>} : vector<8x4xf32>, vector<4x256xf32>, vector<8x256xf32> -> vector<8x256xf32>
    %35 = arith.addf %24, %34 : vector<8x256xf32>
    %36 = vector.extract_strided_slice %31 {offsets = [4, 0], sizes = [4, 256], strides = [1, 1]} : vector<8x256xf32> to vector<4x256xf32>
    %cst_13 = arith.constant dense<0.000000e+00> : vector<8x256xf32>
    %37 = tpu.matmul %32, %36, %cst_13 {dimension_numbers = #tpu.dot_dimension_numbers<[1], [0], [0], [1], [0, 0, 1, 1], [], []>} : vector<8x4xf32>, vector<4x256xf32>, vector<8x256xf32> -> vector<8x256xf32>
    %38 = arith.addf %27, %37 : vector<8x256xf32>
    %c1_i32 = arith.constant 1 : i32
    %39 = tpu.dynamic_rotate %0 by %c1_i32 dim 1 : vector<8x256xf32>, i32 -> vector<8x256xf32>
    %40 = vector.extract_strided_slice %1 {offsets = [3, 0], sizes = [1, 256], strides = [1, 1]} : vector<9x256xf32> to vector<1x256xf32>
    %41 = vector.broadcast %40 : vector<1x256xf32> to vector<8x256xf32>
    %42 = arith.mulf %39, %41 : vector<8x256xf32>
    %43 = vector.extract_strided_slice %2 {offsets = [24, 0], sizes = [8, 4], strides = [1, 1]} : vector<72x4xf32> to vector<8x4xf32>
    %44 = vector.extract_strided_slice %42 {offsets = [0, 0], sizes = [4, 256], strides = [1, 1]} : vector<8x256xf32> to vector<4x256xf32>
    %cst_14 = arith.constant dense<0.000000e+00> : vector<8x256xf32>
    %45 = tpu.matmul %43, %44, %cst_14 {dimension_numbers = #tpu.dot_dimension_numbers<[1], [0], [0], [1], [0, 0, 1, 1], [], []>} : vector<8x4xf32>, vector<4x256xf32>, vector<8x256xf32> -> vector<8x256xf32>
    %46 = arith.addf %35, %45 : vector<8x256xf32>
    %47 = vector.extract_strided_slice %42 {offsets = [4, 0], sizes = [4, 256], strides = [1, 1]} : vector<8x256xf32> to vector<4x256xf32>
    %cst_15 = arith.constant dense<0.000000e+00> : vector<8x256xf32>
    %48 = tpu.matmul %43, %47, %cst_15 {dimension_numbers = #tpu.dot_dimension_numbers<[1], [0], [0], [1], [0, 0, 1, 1], [], []>} : vector<8x4xf32>, vector<4x256xf32>, vector<8x256xf32> -> vector<8x256xf32>
    %49 = arith.addf %38, %48 : vector<8x256xf32>
    %50 = vector.extract_strided_slice %2 {offsets = [32, 0], sizes = [8, 4], strides = [1, 1]} : vector<72x4xf32> to vector<8x4xf32>
    %51 = vector.extract_strided_slice %0 {offsets = [0, 0], sizes = [4, 256], strides = [1, 1]} : vector<8x256xf32> to vector<4x256xf32>
    %cst_16 = arith.constant dense<0.000000e+00> : vector<8x256xf32>
    %52 = tpu.matmul %50, %51, %cst_16 {dimension_numbers = #tpu.dot_dimension_numbers<[1], [0], [0], [1], [0, 0, 1, 1], [], []>} : vector<8x4xf32>, vector<4x256xf32>, vector<8x256xf32> -> vector<8x256xf32>
    %53 = arith.addf %46, %52 : vector<8x256xf32>
    %54 = vector.extract_strided_slice %0 {offsets = [4, 0], sizes = [4, 256], strides = [1, 1]} : vector<8x256xf32> to vector<4x256xf32>
    %cst_17 = arith.constant dense<0.000000e+00> : vector<8x256xf32>
    %55 = tpu.matmul %50, %54, %cst_17 {dimension_numbers = #tpu.dot_dimension_numbers<[1], [0], [0], [1], [0, 0, 1, 1], [], []>} : vector<8x4xf32>, vector<4x256xf32>, vector<8x256xf32> -> vector<8x256xf32>
    %56 = arith.addf %49, %55 : vector<8x256xf32>
    %c255_i32 = arith.constant 255 : i32
    %57 = tpu.dynamic_rotate %0 by %c255_i32 dim 1 : vector<8x256xf32>, i32 -> vector<8x256xf32>
    %58 = vector.extract_strided_slice %1 {offsets = [5, 0], sizes = [1, 256], strides = [1, 1]} : vector<9x256xf32> to vector<1x256xf32>
    %59 = vector.broadcast %58 : vector<1x256xf32> to vector<8x256xf32>
    %60 = arith.mulf %57, %59 : vector<8x256xf32>
    %61 = vector.extract_strided_slice %2 {offsets = [40, 0], sizes = [8, 4], strides = [1, 1]} : vector<72x4xf32> to vector<8x4xf32>
    %62 = vector.extract_strided_slice %60 {offsets = [0, 0], sizes = [4, 256], strides = [1, 1]} : vector<8x256xf32> to vector<4x256xf32>
    %cst_18 = arith.constant dense<0.000000e+00> : vector<8x256xf32>
    %63 = tpu.matmul %61, %62, %cst_18 {dimension_numbers = #tpu.dot_dimension_numbers<[1], [0], [0], [1], [0, 0, 1, 1], [], []>} : vector<8x4xf32>, vector<4x256xf32>, vector<8x256xf32> -> vector<8x256xf32>
    %64 = arith.addf %53, %63 : vector<8x256xf32>
    %65 = vector.extract_strided_slice %60 {offsets = [4, 0], sizes = [4, 256], strides = [1, 1]} : vector<8x256xf32> to vector<4x256xf32>
    %cst_19 = arith.constant dense<0.000000e+00> : vector<8x256xf32>
    %66 = tpu.matmul %61, %65, %cst_19 {dimension_numbers = #tpu.dot_dimension_numbers<[1], [0], [0], [1], [0, 0, 1, 1], [], []>} : vector<8x4xf32>, vector<4x256xf32>, vector<8x256xf32> -> vector<8x256xf32>
    %67 = arith.addf %56, %66 : vector<8x256xf32>
    %c241_i32 = arith.constant 241 : i32
    %68 = tpu.dynamic_rotate %0 by %c241_i32 dim 1 : vector<8x256xf32>, i32 -> vector<8x256xf32>
    %69 = vector.extract_strided_slice %1 {offsets = [6, 0], sizes = [1, 256], strides = [1, 1]} : vector<9x256xf32> to vector<1x256xf32>
    %70 = vector.broadcast %69 : vector<1x256xf32> to vector<8x256xf32>
    %71 = arith.mulf %68, %70 : vector<8x256xf32>
    %72 = vector.extract_strided_slice %2 {offsets = [48, 0], sizes = [8, 4], strides = [1, 1]} : vector<72x4xf32> to vector<8x4xf32>
    %73 = vector.extract_strided_slice %71 {offsets = [0, 0], sizes = [4, 256], strides = [1, 1]} : vector<8x256xf32> to vector<4x256xf32>
    %cst_20 = arith.constant dense<0.000000e+00> : vector<8x256xf32>
    %74 = tpu.matmul %72, %73, %cst_20 {dimension_numbers = #tpu.dot_dimension_numbers<[1], [0], [0], [1], [0, 0, 1, 1], [], []>} : vector<8x4xf32>, vector<4x256xf32>, vector<8x256xf32> -> vector<8x256xf32>
    %75 = arith.addf %64, %74 : vector<8x256xf32>
    %76 = vector.extract_strided_slice %71 {offsets = [4, 0], sizes = [4, 256], strides = [1, 1]} : vector<8x256xf32> to vector<4x256xf32>
    %cst_21 = arith.constant dense<0.000000e+00> : vector<8x256xf32>
    %77 = tpu.matmul %72, %76, %cst_21 {dimension_numbers = #tpu.dot_dimension_numbers<[1], [0], [0], [1], [0, 0, 1, 1], [], []>} : vector<8x4xf32>, vector<4x256xf32>, vector<8x256xf32> -> vector<8x256xf32>
    %78 = arith.addf %67, %77 : vector<8x256xf32>
    %c240_i32 = arith.constant 240 : i32
    %79 = tpu.dynamic_rotate %0 by %c240_i32 dim 1 : vector<8x256xf32>, i32 -> vector<8x256xf32>
    %80 = vector.extract_strided_slice %1 {offsets = [7, 0], sizes = [1, 256], strides = [1, 1]} : vector<9x256xf32> to vector<1x256xf32>
    %81 = vector.broadcast %80 : vector<1x256xf32> to vector<8x256xf32>
    %82 = arith.mulf %79, %81 : vector<8x256xf32>
    %83 = vector.extract_strided_slice %2 {offsets = [56, 0], sizes = [8, 4], strides = [1, 1]} : vector<72x4xf32> to vector<8x4xf32>
    %84 = vector.extract_strided_slice %82 {offsets = [0, 0], sizes = [4, 256], strides = [1, 1]} : vector<8x256xf32> to vector<4x256xf32>
    %cst_22 = arith.constant dense<0.000000e+00> : vector<8x256xf32>
    %85 = tpu.matmul %83, %84, %cst_22 {dimension_numbers = #tpu.dot_dimension_numbers<[1], [0], [0], [1], [0, 0, 1, 1], [], []>} : vector<8x4xf32>, vector<4x256xf32>, vector<8x256xf32> -> vector<8x256xf32>
    %86 = arith.addf %75, %85 : vector<8x256xf32>
    %87 = vector.extract_strided_slice %82 {offsets = [4, 0], sizes = [4, 256], strides = [1, 1]} : vector<8x256xf32> to vector<4x256xf32>
    %cst_23 = arith.constant dense<0.000000e+00> : vector<8x256xf32>
    %88 = tpu.matmul %83, %87, %cst_23 {dimension_numbers = #tpu.dot_dimension_numbers<[1], [0], [0], [1], [0, 0, 1, 1], [], []>} : vector<8x4xf32>, vector<4x256xf32>, vector<8x256xf32> -> vector<8x256xf32>
    %89 = arith.addf %78, %88 : vector<8x256xf32>
    %c239_i32 = arith.constant 239 : i32
    %90 = tpu.dynamic_rotate %0 by %c239_i32 dim 1 : vector<8x256xf32>, i32 -> vector<8x256xf32>
    %91 = vector.extract_strided_slice %1 {offsets = [8, 0], sizes = [1, 256], strides = [1, 1]} : vector<9x256xf32> to vector<1x256xf32>
    %92 = vector.broadcast %91 : vector<1x256xf32> to vector<8x256xf32>
    %93 = arith.mulf %90, %92 : vector<8x256xf32>
    %94 = vector.extract_strided_slice %2 {offsets = [64, 0], sizes = [8, 4], strides = [1, 1]} : vector<72x4xf32> to vector<8x4xf32>
    %95 = vector.extract_strided_slice %93 {offsets = [0, 0], sizes = [4, 256], strides = [1, 1]} : vector<8x256xf32> to vector<4x256xf32>
    %cst_24 = arith.constant dense<0.000000e+00> : vector<8x256xf32>
    %96 = tpu.matmul %94, %95, %cst_24 {dimension_numbers = #tpu.dot_dimension_numbers<[1], [0], [0], [1], [0, 0, 1, 1], [], []>} : vector<8x4xf32>, vector<4x256xf32>, vector<8x256xf32> -> vector<8x256xf32>
    %97 = arith.addf %86, %96 : vector<8x256xf32>
    %98 = vector.extract_strided_slice %93 {offsets = [4, 0], sizes = [4, 256], strides = [1, 1]} : vector<8x256xf32> to vector<4x256xf32>
    %cst_25 = arith.constant dense<0.000000e+00> : vector<8x256xf32>
    %99 = tpu.matmul %94, %98, %cst_25 {dimension_numbers = #tpu.dot_dimension_numbers<[1], [0], [0], [1], [0, 0, 1, 1], [], []>} : vector<8x4xf32>, vector<4x256xf32>, vector<8x256xf32> -> vector<8x256xf32>
    %100 = arith.addf %89, %99 : vector<8x256xf32>
    %cst_26 = arith.constant dense<0.000000e+00> : vector<8xf32>
    %101 = vector.multi_reduction <add>, %97, %cst_26 [1] : vector<8x256xf32> to vector<8xf32>
    %102 = vector.shape_cast %101 : vector<8xf32> to vector<8x1xf32>
    %cst_27 = arith.constant 0.000000e+00 : f32
    %103 = vector.broadcast %cst_27 : f32 to vector<8x1xf32>
    %104 = arith.addf %103, %102 : vector<8x1xf32>
    %cst_28 = arith.constant dense<0.000000e+00> : vector<8xf32>
    %105 = vector.multi_reduction <add>, %100, %cst_28 [1] : vector<8x256xf32> to vector<8xf32>
    %106 = vector.shape_cast %105 : vector<8xf32> to vector<8x1xf32>
    %107 = arith.addf %104, %106 : vector<8x1xf32>
    %cst_29 = arith.constant 5.120000e+02 : f32
    %108 = vector.broadcast %cst_29 : f32 to vector<8x1xf32>
    %109 = arith.divf %107, %108 : vector<8x1xf32>
    %110 = vector.broadcast %109 : vector<8x1xf32> to vector<8x256xf32>
    %111 = arith.subf %97, %110 : vector<8x256xf32>
    %112 = vector.broadcast %109 : vector<8x1xf32> to vector<8x256xf32>
    %113 = arith.subf %97, %112 : vector<8x256xf32>
    %114 = arith.mulf %111, %113 : vector<8x256xf32>
    %cst_30 = arith.constant dense<0.000000e+00> : vector<8xf32>
    %115 = vector.multi_reduction <add>, %114, %cst_30 [1] : vector<8x256xf32> to vector<8xf32>
    %116 = vector.shape_cast %115 : vector<8xf32> to vector<8x1xf32>
    %cst_31 = arith.constant 0.000000e+00 : f32
    %117 = vector.broadcast %cst_31 : f32 to vector<8x1xf32>
    %118 = arith.addf %117, %116 : vector<8x1xf32>
    %119 = vector.broadcast %109 : vector<8x1xf32> to vector<8x256xf32>
    %120 = arith.subf %100, %119 : vector<8x256xf32>
    %121 = vector.broadcast %109 : vector<8x1xf32> to vector<8x256xf32>
    %122 = arith.subf %100, %121 : vector<8x256xf32>
    %123 = arith.mulf %120, %122 : vector<8x256xf32>
    %cst_32 = arith.constant dense<0.000000e+00> : vector<8xf32>
    %124 = vector.multi_reduction <add>, %123, %cst_32 [1] : vector<8x256xf32> to vector<8xf32>
    %125 = vector.shape_cast %124 : vector<8xf32> to vector<8x1xf32>
    %126 = arith.addf %118, %125 : vector<8x1xf32>
    %cst_33 = arith.constant 5.120000e+02 : f32
    %127 = vector.broadcast %cst_33 : f32 to vector<8x1xf32>
    %128 = arith.divf %126, %127 : vector<8x1xf32>
    %c0_34 = arith.constant 0 : index
    %c0_35 = arith.constant 0 : index
    %129 = vector.load %arg3[%c0_34, %c0_35] : memref<8x1xf32, #tpu.memory_space<vmem>>, vector<8x1xf32>
    %cst_36 = arith.constant 9.99999974E-6 : f32
    %130 = vector.broadcast %cst_36 : f32 to vector<8x1xf32>
    %131 = arith.addf %128, %130 : vector<8x1xf32>
    %132 = math.rsqrt %131 : vector<8x1xf32>
    %133 = arith.mulf %129, %132 : vector<8x1xf32>
    %c0_37 = arith.constant 0 : index
    %c0_38 = arith.constant 0 : index
    %134 = vector.load %arg4[%c0_37, %c0_38] : memref<8x1xf32, #tpu.memory_space<vmem>>, vector<8x1xf32>
    %135 = arith.mulf %109, %133 : vector<8x1xf32>
    %136 = arith.subf %134, %135 : vector<8x1xf32>
    %137 = vector.broadcast %133 : vector<8x1xf32> to vector<8x256xf32>
    %138 = arith.mulf %97, %137 : vector<8x256xf32>
    %139 = vector.broadcast %136 : vector<8x1xf32> to vector<8x256xf32>
    %140 = arith.addf %138, %139 : vector<8x256xf32>
    %cst_39 = arith.constant 0.000000e+00 : f32
    %141 = vector.broadcast %cst_39 : f32 to vector<8x256xf32>
    %142 = arith.cmpf ogt, %140, %141 : vector<8x256xf32>
    %cst_40 = arith.constant 2.000000e-01 : f32
    %143 = vector.broadcast %cst_40 : f32 to vector<8x256xf32>
    %144 = arith.mulf %143, %140 : vector<8x256xf32>
    %145 = arith.select %142, %140, %144 : vector<8x256xi1>, vector<8x256xf32>
    %146 = vector.broadcast %133 : vector<8x1xf32> to vector<8x256xf32>
    %147 = arith.mulf %100, %146 : vector<8x256xf32>
    %148 = vector.broadcast %136 : vector<8x1xf32> to vector<8x256xf32>
    %149 = arith.addf %147, %148 : vector<8x256xf32>
    %cst_41 = arith.constant 0.000000e+00 : f32
    %150 = vector.broadcast %cst_41 : f32 to vector<8x256xf32>
    %151 = arith.cmpf ogt, %149, %150 : vector<8x256xf32>
    %cst_42 = arith.constant 2.000000e-01 : f32
    %152 = vector.broadcast %cst_42 : f32 to vector<8x256xf32>
    %153 = arith.mulf %152, %149 : vector<8x256xf32>
    %154 = arith.select %151, %149, %153 : vector<8x256xi1>, vector<8x256xf32>
    %155 = tpu.concatenate %145, %154 in 0 : vector<8x256xf32>, vector<8x256xf32> -> vector<16x256xf32>
    %cst_43 = arith.constant 0.000000e+00 : f32
    %156 = vector.broadcast %cst_43 : f32 to vector<4x256xf32>
    %cst_44 = arith.constant 0.000000e+00 : f32
    %157 = vector.broadcast %cst_44 : f32 to vector<4x256xf32>
    %c17_i32_45 = arith.constant 17 : i32
    %158 = tpu.dynamic_rotate %155 by %c17_i32_45 dim 1 : vector<16x256xf32>, i32 -> vector<16x256xf32>
    %159 = vector.extract_strided_slice %1 {offsets = [0, 0], sizes = [1, 256], strides = [1, 1]} : vector<9x256xf32> to vector<1x256xf32>
    %160 = vector.broadcast %159 : vector<1x256xf32> to vector<16x256xf32>
    %161 = arith.mulf %158, %160 : vector<16x256xf32>
    %162 = vector.extract_strided_slice %3 {offsets = [0, 0], sizes = [4, 8], strides = [1, 1]} : vector<36x8xf32> to vector<4x8xf32>
    %163 = vector.extract_strided_slice %161 {offsets = [0, 0], sizes = [8, 256], strides = [1, 1]} : vector<16x256xf32> to vector<8x256xf32>
    %cst_46 = arith.constant dense<0.000000e+00> : vector<4x256xf32>
    %164 = tpu.matmul %162, %163, %cst_46 {dimension_numbers = #tpu.dot_dimension_numbers<[1], [0], [0], [1], [0, 0, 1, 1], [], []>} : vector<4x8xf32>, vector<8x256xf32>, vector<4x256xf32> -> vector<4x256xf32>
    %165 = arith.addf %156, %164 : vector<4x256xf32>
    %166 = vector.extract_strided_slice %161 {offsets = [8, 0], sizes = [8, 256], strides = [1, 1]} : vector<16x256xf32> to vector<8x256xf32>
    %cst_47 = arith.constant dense<0.000000e+00> : vector<4x256xf32>
    %167 = tpu.matmul %162, %166, %cst_47 {dimension_numbers = #tpu.dot_dimension_numbers<[1], [0], [0], [1], [0, 0, 1, 1], [], []>} : vector<4x8xf32>, vector<8x256xf32>, vector<4x256xf32> -> vector<4x256xf32>
    %168 = arith.addf %157, %167 : vector<4x256xf32>
    %c16_i32_48 = arith.constant 16 : i32
    %169 = tpu.dynamic_rotate %155 by %c16_i32_48 dim 1 : vector<16x256xf32>, i32 -> vector<16x256xf32>
    %170 = vector.extract_strided_slice %1 {offsets = [1, 0], sizes = [1, 256], strides = [1, 1]} : vector<9x256xf32> to vector<1x256xf32>
    %171 = vector.broadcast %170 : vector<1x256xf32> to vector<16x256xf32>
    %172 = arith.mulf %169, %171 : vector<16x256xf32>
    %173 = vector.extract_strided_slice %3 {offsets = [4, 0], sizes = [4, 8], strides = [1, 1]} : vector<36x8xf32> to vector<4x8xf32>
    %174 = vector.extract_strided_slice %172 {offsets = [0, 0], sizes = [8, 256], strides = [1, 1]} : vector<16x256xf32> to vector<8x256xf32>
    %cst_49 = arith.constant dense<0.000000e+00> : vector<4x256xf32>
    %175 = tpu.matmul %173, %174, %cst_49 {dimension_numbers = #tpu.dot_dimension_numbers<[1], [0], [0], [1], [0, 0, 1, 1], [], []>} : vector<4x8xf32>, vector<8x256xf32>, vector<4x256xf32> -> vector<4x256xf32>
    %176 = arith.addf %165, %175 : vector<4x256xf32>
    %177 = vector.extract_strided_slice %172 {offsets = [8, 0], sizes = [8, 256], strides = [1, 1]} : vector<16x256xf32> to vector<8x256xf32>
    %cst_50 = arith.constant dense<0.000000e+00> : vector<4x256xf32>
    %178 = tpu.matmul %173, %177, %cst_50 {dimension_numbers = #tpu.dot_dimension_numbers<[1], [0], [0], [1], [0, 0, 1, 1], [], []>} : vector<4x8xf32>, vector<8x256xf32>, vector<4x256xf32> -> vector<4x256xf32>
    %179 = arith.addf %168, %178 : vector<4x256xf32>
    %c15_i32_51 = arith.constant 15 : i32
    %180 = tpu.dynamic_rotate %155 by %c15_i32_51 dim 1 : vector<16x256xf32>, i32 -> vector<16x256xf32>
    %181 = vector.extract_strided_slice %1 {offsets = [2, 0], sizes = [1, 256], strides = [1, 1]} : vector<9x256xf32> to vector<1x256xf32>
    %182 = vector.broadcast %181 : vector<1x256xf32> to vector<16x256xf32>
    %183 = arith.mulf %180, %182 : vector<16x256xf32>
    %184 = vector.extract_strided_slice %3 {offsets = [8, 0], sizes = [4, 8], strides = [1, 1]} : vector<36x8xf32> to vector<4x8xf32>
    %185 = vector.extract_strided_slice %183 {offsets = [0, 0], sizes = [8, 256], strides = [1, 1]} : vector<16x256xf32> to vector<8x256xf32>
    %cst_52 = arith.constant dense<0.000000e+00> : vector<4x256xf32>
    %186 = tpu.matmul %184, %185, %cst_52 {dimension_numbers = #tpu.dot_dimension_numbers<[1], [0], [0], [1], [0, 0, 1, 1], [], []>} : vector<4x8xf32>, vector<8x256xf32>, vector<4x256xf32> -> vector<4x256xf32>
    %187 = arith.addf %176, %186 : vector<4x256xf32>
    %188 = vector.extract_strided_slice %183 {offsets = [8, 0], sizes = [8, 256], strides = [1, 1]} : vector<16x256xf32> to vector<8x256xf32>
    %cst_53 = arith.constant dense<0.000000e+00> : vector<4x256xf32>
    %189 = tpu.matmul %184, %188, %cst_53 {dimension_numbers = #tpu.dot_dimension_numbers<[1], [0], [0], [1], [0, 0, 1, 1], [], []>} : vector<4x8xf32>, vector<8x256xf32>, vector<4x256xf32> -> vector<4x256xf32>
    %190 = arith.addf %179, %189 : vector<4x256xf32>
    %c1_i32_54 = arith.constant 1 : i32
    %191 = tpu.dynamic_rotate %155 by %c1_i32_54 dim 1 : vector<16x256xf32>, i32 -> vector<16x256xf32>
    %192 = vector.extract_strided_slice %1 {offsets = [3, 0], sizes = [1, 256], strides = [1, 1]} : vector<9x256xf32> to vector<1x256xf32>
    %193 = vector.broadcast %192 : vector<1x256xf32> to vector<16x256xf32>
    %194 = arith.mulf %191, %193 : vector<16x256xf32>
    %195 = vector.extract_strided_slice %3 {offsets = [12, 0], sizes = [4, 8], strides = [1, 1]} : vector<36x8xf32> to vector<4x8xf32>
    %196 = vector.extract_strided_slice %194 {offsets = [0, 0], sizes = [8, 256], strides = [1, 1]} : vector<16x256xf32> to vector<8x256xf32>
    %cst_55 = arith.constant dense<0.000000e+00> : vector<4x256xf32>
    %197 = tpu.matmul %195, %196, %cst_55 {dimension_numbers = #tpu.dot_dimension_numbers<[1], [0], [0], [1], [0, 0, 1, 1], [], []>} : vector<4x8xf32>, vector<8x256xf32>, vector<4x256xf32> -> vector<4x256xf32>
    %198 = arith.addf %187, %197 : vector<4x256xf32>
    %199 = vector.extract_strided_slice %194 {offsets = [8, 0], sizes = [8, 256], strides = [1, 1]} : vector<16x256xf32> to vector<8x256xf32>
    %cst_56 = arith.constant dense<0.000000e+00> : vector<4x256xf32>
    %200 = tpu.matmul %195, %199, %cst_56 {dimension_numbers = #tpu.dot_dimension_numbers<[1], [0], [0], [1], [0, 0, 1, 1], [], []>} : vector<4x8xf32>, vector<8x256xf32>, vector<4x256xf32> -> vector<4x256xf32>
    %201 = arith.addf %190, %200 : vector<4x256xf32>
    %202 = vector.extract_strided_slice %3 {offsets = [16, 0], sizes = [4, 8], strides = [1, 1]} : vector<36x8xf32> to vector<4x8xf32>
    %203 = vector.extract_strided_slice %155 {offsets = [0, 0], sizes = [8, 256], strides = [1, 1]} : vector<16x256xf32> to vector<8x256xf32>
    %cst_57 = arith.constant dense<0.000000e+00> : vector<4x256xf32>
    %204 = tpu.matmul %202, %203, %cst_57 {dimension_numbers = #tpu.dot_dimension_numbers<[1], [0], [0], [1], [0, 0, 1, 1], [], []>} : vector<4x8xf32>, vector<8x256xf32>, vector<4x256xf32> -> vector<4x256xf32>
    %205 = arith.addf %198, %204 : vector<4x256xf32>
    %206 = vector.extract_strided_slice %155 {offsets = [8, 0], sizes = [8, 256], strides = [1, 1]} : vector<16x256xf32> to vector<8x256xf32>
    %cst_58 = arith.constant dense<0.000000e+00> : vector<4x256xf32>
    %207 = tpu.matmul %202, %206, %cst_58 {dimension_numbers = #tpu.dot_dimension_numbers<[1], [0], [0], [1], [0, 0, 1, 1], [], []>} : vector<4x8xf32>, vector<8x256xf32>, vector<4x256xf32> -> vector<4x256xf32>
    %208 = arith.addf %201, %207 : vector<4x256xf32>
    %c255_i32_59 = arith.constant 255 : i32
    %209 = tpu.dynamic_rotate %155 by %c255_i32_59 dim 1 : vector<16x256xf32>, i32 -> vector<16x256xf32>
    %210 = vector.extract_strided_slice %1 {offsets = [5, 0], sizes = [1, 256], strides = [1, 1]} : vector<9x256xf32> to vector<1x256xf32>
    %211 = vector.broadcast %210 : vector<1x256xf32> to vector<16x256xf32>
    %212 = arith.mulf %209, %211 : vector<16x256xf32>
    %213 = vector.extract_strided_slice %3 {offsets = [20, 0], sizes = [4, 8], strides = [1, 1]} : vector<36x8xf32> to vector<4x8xf32>
    %214 = vector.extract_strided_slice %212 {offsets = [0, 0], sizes = [8, 256], strides = [1, 1]} : vector<16x256xf32> to vector<8x256xf32>
    %cst_60 = arith.constant dense<0.000000e+00> : vector<4x256xf32>
    %215 = tpu.matmul %213, %214, %cst_60 {dimension_numbers = #tpu.dot_dimension_numbers<[1], [0], [0], [1], [0, 0, 1, 1], [], []>} : vector<4x8xf32>, vector<8x256xf32>, vector<4x256xf32> -> vector<4x256xf32>
    %216 = arith.addf %205, %215 : vector<4x256xf32>
    %217 = vector.extract_strided_slice %212 {offsets = [8, 0], sizes = [8, 256], strides = [1, 1]} : vector<16x256xf32> to vector<8x256xf32>
    %cst_61 = arith.constant dense<0.000000e+00> : vector<4x256xf32>
    %218 = tpu.matmul %213, %217, %cst_61 {dimension_numbers = #tpu.dot_dimension_numbers<[1], [0], [0], [1], [0, 0, 1, 1], [], []>} : vector<4x8xf32>, vector<8x256xf32>, vector<4x256xf32> -> vector<4x256xf32>
    %219 = arith.addf %208, %218 : vector<4x256xf32>
    %c241_i32_62 = arith.constant 241 : i32
    %220 = tpu.dynamic_rotate %155 by %c241_i32_62 dim 1 : vector<16x256xf32>, i32 -> vector<16x256xf32>
    %221 = vector.extract_strided_slice %1 {offsets = [6, 0], sizes = [1, 256], strides = [1, 1]} : vector<9x256xf32> to vector<1x256xf32>
    %222 = vector.broadcast %221 : vector<1x256xf32> to vector<16x256xf32>
    %223 = arith.mulf %220, %222 : vector<16x256xf32>
    %224 = vector.extract_strided_slice %3 {offsets = [24, 0], sizes = [4, 8], strides = [1, 1]} : vector<36x8xf32> to vector<4x8xf32>
    %225 = vector.extract_strided_slice %223 {offsets = [0, 0], sizes = [8, 256], strides = [1, 1]} : vector<16x256xf32> to vector<8x256xf32>
    %cst_63 = arith.constant dense<0.000000e+00> : vector<4x256xf32>
    %226 = tpu.matmul %224, %225, %cst_63 {dimension_numbers = #tpu.dot_dimension_numbers<[1], [0], [0], [1], [0, 0, 1, 1], [], []>} : vector<4x8xf32>, vector<8x256xf32>, vector<4x256xf32> -> vector<4x256xf32>
    %227 = arith.addf %216, %226 : vector<4x256xf32>
    %228 = vector.extract_strided_slice %223 {offsets = [8, 0], sizes = [8, 256], strides = [1, 1]} : vector<16x256xf32> to vector<8x256xf32>
    %cst_64 = arith.constant dense<0.000000e+00> : vector<4x256xf32>
    %229 = tpu.matmul %224, %228, %cst_64 {dimension_numbers = #tpu.dot_dimension_numbers<[1], [0], [0], [1], [0, 0, 1, 1], [], []>} : vector<4x8xf32>, vector<8x256xf32>, vector<4x256xf32> -> vector<4x256xf32>
    %230 = arith.addf %219, %229 : vector<4x256xf32>
    %c240_i32_65 = arith.constant 240 : i32
    %231 = tpu.dynamic_rotate %155 by %c240_i32_65 dim 1 : vector<16x256xf32>, i32 -> vector<16x256xf32>
    %232 = vector.extract_strided_slice %1 {offsets = [7, 0], sizes = [1, 256], strides = [1, 1]} : vector<9x256xf32> to vector<1x256xf32>
    %233 = vector.broadcast %232 : vector<1x256xf32> to vector<16x256xf32>
    %234 = arith.mulf %231, %233 : vector<16x256xf32>
    %235 = vector.extract_strided_slice %3 {offsets = [28, 0], sizes = [4, 8], strides = [1, 1]} : vector<36x8xf32> to vector<4x8xf32>
    %236 = vector.extract_strided_slice %234 {offsets = [0, 0], sizes = [8, 256], strides = [1, 1]} : vector<16x256xf32> to vector<8x256xf32>
    %cst_66 = arith.constant dense<0.000000e+00> : vector<4x256xf32>
    %237 = tpu.matmul %235, %236, %cst_66 {dimension_numbers = #tpu.dot_dimension_numbers<[1], [0], [0], [1], [0, 0, 1, 1], [], []>} : vector<4x8xf32>, vector<8x256xf32>, vector<4x256xf32> -> vector<4x256xf32>
    %238 = arith.addf %227, %237 : vector<4x256xf32>
    %239 = vector.extract_strided_slice %234 {offsets = [8, 0], sizes = [8, 256], strides = [1, 1]} : vector<16x256xf32> to vector<8x256xf32>
    %cst_67 = arith.constant dense<0.000000e+00> : vector<4x256xf32>
    %240 = tpu.matmul %235, %239, %cst_67 {dimension_numbers = #tpu.dot_dimension_numbers<[1], [0], [0], [1], [0, 0, 1, 1], [], []>} : vector<4x8xf32>, vector<8x256xf32>, vector<4x256xf32> -> vector<4x256xf32>
    %241 = arith.addf %230, %240 : vector<4x256xf32>
    %c239_i32_68 = arith.constant 239 : i32
    %242 = tpu.dynamic_rotate %155 by %c239_i32_68 dim 1 : vector<16x256xf32>, i32 -> vector<16x256xf32>
    %243 = vector.extract_strided_slice %1 {offsets = [8, 0], sizes = [1, 256], strides = [1, 1]} : vector<9x256xf32> to vector<1x256xf32>
    %244 = vector.broadcast %243 : vector<1x256xf32> to vector<16x256xf32>
    %245 = arith.mulf %242, %244 : vector<16x256xf32>
    %246 = vector.extract_strided_slice %3 {offsets = [32, 0], sizes = [4, 8], strides = [1, 1]} : vector<36x8xf32> to vector<4x8xf32>
    %247 = vector.extract_strided_slice %245 {offsets = [0, 0], sizes = [8, 256], strides = [1, 1]} : vector<16x256xf32> to vector<8x256xf32>
    %cst_69 = arith.constant dense<0.000000e+00> : vector<4x256xf32>
    %248 = tpu.matmul %246, %247, %cst_69 {dimension_numbers = #tpu.dot_dimension_numbers<[1], [0], [0], [1], [0, 0, 1, 1], [], []>} : vector<4x8xf32>, vector<8x256xf32>, vector<4x256xf32> -> vector<4x256xf32>
    %249 = arith.addf %238, %248 : vector<4x256xf32>
    %250 = vector.extract_strided_slice %245 {offsets = [8, 0], sizes = [8, 256], strides = [1, 1]} : vector<16x256xf32> to vector<8x256xf32>
    %cst_70 = arith.constant dense<0.000000e+00> : vector<4x256xf32>
    %251 = tpu.matmul %246, %250, %cst_70 {dimension_numbers = #tpu.dot_dimension_numbers<[1], [0], [0], [1], [0, 0, 1, 1], [], []>} : vector<4x8xf32>, vector<8x256xf32>, vector<4x256xf32> -> vector<4x256xf32>
    %252 = arith.addf %241, %251 : vector<4x256xf32>
    %c0_71 = arith.constant 0 : index
    %c0_72 = arith.constant 0 : index
    %253 = vector.load %arg6[%c0_71, %c0_72] : memref<4x1xf32, #tpu.memory_space<vmem>>, vector<4x1xf32>
    %254 = vector.broadcast %253 : vector<4x1xf32> to vector<4x256xf32>
    %255 = arith.addf %249, %254 : vector<4x256xf32>
    %c0_73 = arith.constant 0 : index
    %c0_74 = arith.constant 0 : index
    %256 = vector.load %arg6[%c0_73, %c0_74] : memref<4x1xf32, #tpu.memory_space<vmem>>, vector<4x1xf32>
    %257 = vector.broadcast %256 : vector<4x1xf32> to vector<4x256xf32>
    %258 = arith.addf %252, %257 : vector<4x256xf32>
    %cst_75 = arith.constant dense<0.000000e+00> : vector<4xf32>
    %259 = vector.multi_reduction <add>, %255, %cst_75 [1] : vector<4x256xf32> to vector<4xf32>
    %260 = vector.shape_cast %259 : vector<4xf32> to vector<4x1xf32>
    %cst_76 = arith.constant 0.000000e+00 : f32
    %261 = vector.broadcast %cst_76 : f32 to vector<4x1xf32>
    %262 = arith.addf %261, %260 : vector<4x1xf32>
    %cst_77 = arith.constant dense<0.000000e+00> : vector<4xf32>
    %263 = vector.multi_reduction <add>, %258, %cst_77 [1] : vector<4x256xf32> to vector<4xf32>
    %264 = vector.shape_cast %263 : vector<4xf32> to vector<4x1xf32>
    %265 = arith.addf %262, %264 : vector<4x1xf32>
    %cst_78 = arith.constant 5.120000e+02 : f32
    %266 = vector.broadcast %cst_78 : f32 to vector<4x1xf32>
    %267 = arith.divf %265, %266 : vector<4x1xf32>
    %268 = vector.broadcast %267 : vector<4x1xf32> to vector<4x256xf32>
    %269 = arith.subf %255, %268 : vector<4x256xf32>
    %270 = vector.broadcast %267 : vector<4x1xf32> to vector<4x256xf32>
    %271 = arith.subf %255, %270 : vector<4x256xf32>
    %272 = arith.mulf %269, %271 : vector<4x256xf32>
    %cst_79 = arith.constant dense<0.000000e+00> : vector<4xf32>
    %273 = vector.multi_reduction <add>, %272, %cst_79 [1] : vector<4x256xf32> to vector<4xf32>
    %274 = vector.shape_cast %273 : vector<4xf32> to vector<4x1xf32>
    %cst_80 = arith.constant 0.000000e+00 : f32
    %275 = vector.broadcast %cst_80 : f32 to vector<4x1xf32>
    %276 = arith.addf %275, %274 : vector<4x1xf32>
    %277 = vector.broadcast %267 : vector<4x1xf32> to vector<4x256xf32>
    %278 = arith.subf %258, %277 : vector<4x256xf32>
    %279 = vector.broadcast %267 : vector<4x1xf32> to vector<4x256xf32>
    %280 = arith.subf %258, %279 : vector<4x256xf32>
    %281 = arith.mulf %278, %280 : vector<4x256xf32>
    %cst_81 = arith.constant dense<0.000000e+00> : vector<4xf32>
    %282 = vector.multi_reduction <add>, %281, %cst_81 [1] : vector<4x256xf32> to vector<4xf32>
    %283 = vector.shape_cast %282 : vector<4xf32> to vector<4x1xf32>
    %284 = arith.addf %276, %283 : vector<4x1xf32>
    %cst_82 = arith.constant 5.120000e+02 : f32
    %285 = vector.broadcast %cst_82 : f32 to vector<4x1xf32>
    %286 = arith.divf %284, %285 : vector<4x1xf32>
    %c0_83 = arith.constant 0 : index
    %c0_84 = arith.constant 0 : index
    %287 = vector.load %arg7[%c0_83, %c0_84] : memref<4x1xf32, #tpu.memory_space<vmem>>, vector<4x1xf32>
    %cst_85 = arith.constant 9.99999974E-6 : f32
    %288 = vector.broadcast %cst_85 : f32 to vector<4x1xf32>
    %289 = arith.addf %286, %288 : vector<4x1xf32>
    %290 = math.rsqrt %289 : vector<4x1xf32>
    %291 = arith.mulf %287, %290 : vector<4x1xf32>
    %c0_86 = arith.constant 0 : index
    %c0_87 = arith.constant 0 : index
    %292 = vector.load %arg8[%c0_86, %c0_87] : memref<4x1xf32, #tpu.memory_space<vmem>>, vector<4x1xf32>
    %293 = arith.mulf %267, %291 : vector<4x1xf32>
    %294 = arith.subf %292, %293 : vector<4x1xf32>
    %295 = vector.broadcast %291 : vector<4x1xf32> to vector<4x256xf32>
    %296 = arith.mulf %255, %295 : vector<4x256xf32>
    %297 = vector.broadcast %294 : vector<4x1xf32> to vector<4x256xf32>
    %298 = arith.addf %296, %297 : vector<4x256xf32>
    %299 = vector.extract_strided_slice %0 {offsets = [0, 0], sizes = [4, 256], strides = [1, 1]} : vector<8x256xf32> to vector<4x256xf32>
    %300 = arith.addf %298, %299 : vector<4x256xf32>
    %301 = vector.broadcast %291 : vector<4x1xf32> to vector<4x256xf32>
    %302 = arith.mulf %258, %301 : vector<4x256xf32>
    %303 = vector.broadcast %294 : vector<4x1xf32> to vector<4x256xf32>
    %304 = arith.addf %302, %303 : vector<4x256xf32>
    %305 = vector.extract_strided_slice %0 {offsets = [4, 0], sizes = [4, 256], strides = [1, 1]} : vector<8x256xf32> to vector<4x256xf32>
    %306 = arith.addf %304, %305 : vector<4x256xf32>
    %307 = tpu.concatenate %300, %306 in 0 : vector<4x256xf32>, vector<4x256xf32> -> vector<8x256xf32>
    %c0_88 = arith.constant 0 : index
    %c0_89 = arith.constant 0 : index
    %308 = vector.load %arg9[%c0_88, %c0_89] : memref<8x256xf32, #tpu.memory_space<vmem>>, vector<8x256xf32>
    tpu.vector_store %arg9[%c0_88, %c0_89], %307 {strides = array<i32>} : memref<8x256xf32, #tpu.memory_space<vmem>>, vector<8x256xf32>,
    return
  }
}

</mosaic_0001>

<bundles_post_ra>
// kernel: tpu_custom_call.1
= control target key start
LH: loop header
LB: loop body
LE: loop exit
PB: predicated region body
PF: predicated region fallthrough
CT: control target
= control target key end

     0   :  { %s3440_s11 = smov 16   ;;  %s3441_s12 = smov 17   ;;  %v3442_v2 = vmov 0.0   ;;  %s4053_s0 = inlined_call_operand.vmem [shape: f32[8,256], index: 0, kind: input, shape index: {}]   ;;  %s4054_s1 = inlined_call_operand.vmem [shape: f32[9,256], index: 1, kind: input, shape index: {}]   ;;  %s4055_s2 = inlined_call_operand.vmem [shape: f32[72,4], index: 2, kind: input, shape index: {}]   ;;  %s4056_s3 = inlined_call_operand.vmem [shape: f32[8,1], index: 3, kind: input, shape index: {}]   ;;  %s4057_s4 = inlined_call_operand.vmem [shape: f32[8,1], index: 4, kind: input, shape index: {}]   ;;  %s4058_s5 = inlined_call_operand.vmem [shape: f32[36,8], index: 5, kind: input, shape index: {}]   ;;  %s4059_s6 = inlined_call_operand.vmem [shape: f32[4,1], index: 6, kind: input, shape index: {}]   ;;  %s4060_s7 = inlined_call_operand.vmem [shape: f32[4,1], index: 7, kind: input, shape index: {}]   ;;  %s4061_s8 = inlined_call_operand.vmem [shape: f32[4,1], index: 8, kind: input, shape index: {}]   ;;  %s4062_s9 = inlined_call_operand.hbm [shape: f32[8,256], index: 9, kind: output, shape index: {}]  }
   0x1   :  { %v3504_v0 = vld [vmem:[%s4053_s0] sm:$0xff]  ;;  %v3513_v1 = vld [vmem:[%s4053_s0 + $0x8] sm:$0xff]  ;;  %164 = vmatprep.mubr.f32.mxu0 %v3442_v2  ;;  %321 = vmatprep.mubr.f32.mxu1 %v3442_v2 }
   0x2   :  { %72 = vrot.lane.b32.xlu0 %v3504_v0, %s3440_s11  ;;  %53 = vrot.lane.b32.xlu1 %v3504_v0, %s3441_s12 }
   0x3   :  { %14 = vsyncpa [#allocation3], 0  ;;  %s3443_s15 = smov 15   ;;  %s3444_s16 = smov 1   ;;  %v57_v3 = vlaneseq  ;;  %v3554_v8 = vld [vmem:[%s4054_s1] sm:$0xff]  ;;  %v3559_v9 = vld [vmem:[%s4054_s1 + $0x8] sm:$0xff] }
   0x4   :  { %s3445_s17 = smov 127   ;;  %s3446_s18 = smov 113   ;;  %vm93_vm2 = vcmask 1043456   ;;  %v40_v29 = vld [vmem:[%s4055_s2 + $0x8] sm:$0xff]  ;;  %vm89_vm4 = vcmask 31744   ;;  %v39_v47 = vld [vmem:[%s4055_s2] sm:$0xff] }
   0x5   :  { %s3447_s19 = smov 112   ;;  %s3448_s20 = smov 111   ;;  %v3545_v4 = vshrl.u32 %v57_v3, 7  ;;  %v3547_v5 = vand.u32 127, %v57_v3  ;;  %v41_v54 = vld [vmem:[%s4055_s2 + $0x10] sm:$0xff]  ;;  %v844_v58 = vrot.slane %v3513_v1, 4 }
   0x6   :  { %74 = vrot.lane.b32.xlu0 %v3513_v1, %s3440_s11  ;;  %55 = vrot.lane.b32.xlu1 %v3513_v1, %s3441_s12  ;;  %v42_v63 = vld [vmem:[%s4055_s2 + $0x18] sm:$0xff]  ;;  %vm1732_vm14 = vcmask 64512  }
   0x7   :  { %v81_v6 = vsub.s32 1, %v3545_v4  ;;  %v64_v7 = vsub.s32 0, %v3545_v4  ;;  %v414_v12 = vsub.s32 2, %v3545_v4  ;;  %vm76_vm0 = vcmp.lt.s32.totalorder %v3547_v5, 16 }
   0x8   :  { %vm59_vm1 = vcmp.lt.s32.totalorder %v3547_v5, 17  ;;  %vm409_vm3 = vcmp.lt.s32.totalorder %v3547_v5, 15  ;;  %v592_v20 = vsub.s32 3, %v3545_v4  ;;  %vm587_vm5 = vcmp.lt.s32.totalorder %v3547_v5, 1 }
   0x9   :  { %v3565_v13 = vrot.slane %v3554_v8, %v81_v6  ;;  %v3568_v14 = vrot.slane %v3554_v8, %v64_v7  ;;  %v3571_v15 = vrot.slane %v3559_v9, %v64_v7  ;;  %v3574_v16 = vrot.slane %v3559_v9, %v81_v6 }
   0xa   :  { %407 = vrot.lane.b32.xlu1 %v3513_v1, %s3443_s15  ;;  %405 = vrot.lane.b32.xlu0 %v3504_v0, %s3443_s15  ;;  %v3578_v19 = vrot.slane %v3559_v9, %v414_v12  ;;  %v3599_v35 = vrot.slane %v3554_v8, %v414_v12  ;;  %v3610_v40 = vrot.slane %v3559_v9, %v592_v20  ;;  %v931_v53 = vsub.s32 5, %v3545_v4 }
   0xb   :  { %v3630_v49 = vrot.slane %v3554_v8, %v592_v20  ;;  %vm926_vm6 = vcmp.lt.s32.totalorder %v3547_v5, 127  ;;  %v1109_v62 = vsub.s32 6, %v3545_v4  ;;  %vm1104_vm7 = vcmp.lt.s32.totalorder %v3547_v5, 113 }
   0xc   :  { %v3651_v59 = vrot.slane %v3559_v9, %v931_v53  ;;  %v3672_v7 = vrot.slane %v3554_v8, %v931_v53  ;;  %vm1282_vm8 = vcmp.lt.s32.totalorder %v3547_v5, 112  ;;  %vm1460_vm9 = vcmp.lt.s32.totalorder %v3547_v5, 111  ;;  %v47_v53 = vld [vmem:[%s4055_s2 + $0x40] sm:$0xff] }
   0xe   :  { %585 = vrot.lane.b32.xlu1 %v3513_v1, %s3444_s16  ;;  %583 = vrot.lane.b32.xlu0 %v3504_v0, %s3444_s16 }
  0x12   :  { %924 = vrot.lane.b32.xlu1 %v3513_v1, %s3445_s17  ;;  %922 = vrot.lane.b32.xlu0 %v3504_v0, %s3445_s17 }
  0x16   :  { %1102 = vrot.lane.b32.xlu1 %v3513_v1, %s3446_s18  ;;  %1100 = vrot.lane.b32.xlu0 %v3504_v0, %s3446_s18 }
  0x1a   :  { %1280 = vrot.lane.b32.xlu1 %v3513_v1, %s3447_s19  ;;  %1278 = vrot.lane.b32.xlu0 %v3504_v0, %s3447_s19 }
  0x1e   :  { %1458 = vrot.lane.b32.xlu1 %v3513_v1, %s3448_s20  ;;  %1456 = vrot.lane.b32.xlu0 %v3504_v0, %s3448_s20 }
  0x74   :  { %v73_v10 = vpop.permute.xlu0 %72  ;;  %v54_v11 = vpop.permute.xlu1 %53 }
  0x78   :  { %v75_v17 = vpop.permute.xlu0 %74  ;;  %v56_v18 = vpop.permute.xlu1 %55 }
  0x79   :  { %v77_v21 = vsel %vm76_vm0, %v73_v10, %v75_v17  ;;  %v78_v22 = vsel %vm76_vm0, %v75_v17, %v73_v10  ;;  %v60_v23 = vsel %vm59_vm1, %v54_v11, %v56_v18  ;;  %v61_v24 = vsel %vm59_vm1, %v56_v18, %v54_v11 }
  0x7a   :  { %v87_v25 = vmul.f32 %v3565_v13, %v78_v22  ;;  %v70_v26 = vmul.f32 %v3568_v14, %v61_v24  ;;  %v71_v27 = vmul.f32 %v3571_v15, %v60_v23  ;;  %v88_v28 = vmul.f32 %v3574_v16, %v77_v21  ;;  %v43_v23 = vld [vmem:[%s4055_s2 + $0x20] sm:$0xff] }
  0x7b   :  { %v843_v10 = vrot.slane %v3504_v0, 4  ;;  %v3679_v17 = vrot.slane %v3559_v9, %v1109_v62  ;;  %v1287_v22 = vsub.s32 7, %v3545_v4 }
  0x7c   :  { %3259 = vmatprep.subr.msk.mxu0 %vm93_vm2, %v88_v28  ;;  %v252_v30 = vrot.slane %v88_v28, 4  ;;  %v251_v31 = vrot.slane %v87_v25, 4  ;;  %v408_v32 = vpop.permute.xlu1 %407  ;;  %v406_v33 = vpop.permute.xlu0 %405  ;;  %v329_v34 = vrot.slane %v71_v27, 4  ;;  %v328_v37 = vrot.slane %v70_v26, 4 }
  0x7d   :  { %3260 = vmatpush1.msk.msra.mxu0 %vm93_vm2, %v87_v25  ;;  %v410_v36 = vsel %vm409_vm3, %v406_v33, %v408_v32  ;;  %v411_v38 = vsel %vm409_vm3, %v408_v32, %v406_v33  ;;  %v3707_v4 = vrot.slane %v3559_v9, %v1287_v22  ;;  %v44_v32 = vld [vmem:[%s4055_s2 + $0x28] sm:$0xff] }
  0x7e   :  { %3261 = vmatmul.mubr.msk.f32.vlgmr.msra.gmra.mrb[0].mxu0 %vm89_vm4, %v40_v29  ;;  %3265 = vmatprep.subr.msk.mxu1 %vm93_vm2, %v252_v30  ;;  %v421_v39 = vmul.f32 %v3578_v19, %v410_v36  ;;  %v420_v44 = vmul.f32 %v3599_v35, %v411_v38 }
  0x7f   :  { %3262 = vmatprep.subr.msk.mxu0 %vm93_vm2, %v71_v27  ;;  %3266 = vmatpush1.msk.msra.mxu1 %vm93_vm2, %v251_v31  ;;  %v3701_v27 = vrot.slane %v3554_v8, %v1109_v62 }
  0x80   :  { %3263 = vmatpush1.msk.msra.mxu0 %vm93_vm2, %v70_v26  ;;  %3267 = vmatmul.mubr.msk.f32.vlgmr.msra.gmra.mrb[0].mxu1 %vm89_vm4, %v40_v29  ;;  %v505_v41 = vrot.slane %v421_v39, 4  ;;  %v586_v42 = vpop.permute.xlu1 %585  ;;  %v584_v43 = vpop.permute.xlu0 %583  ;;  %v504_v48 = vrot.slane %v420_v44, 4 }
  0x81   :  { %3268 = vmatprep.subr.msk.mxu1 %vm93_vm2, %v329_v34  ;;  %244 = vmatprep.mubr.f32.mxu0 %v3442_v2  ;;  %v588_v45 = vsel %vm587_vm5, %v584_v43, %v586_v42  ;;  %v589_v50 = vsel %vm587_vm5, %v586_v42, %v584_v43 }
  0x82   :  { %3269 = vmatpush1.msk.msra.mxu1 %vm93_vm2, %v328_v37  ;;  %398 = vmatprep.mubr.f32.mxu1 %v3442_v2  ;;  %v599_v46 = vmul.f32 %v3610_v40, %v588_v45  ;;  %v598_v52 = vmul.f32 %v3630_v49, %v589_v50  ;;  %v3725_v37 = vrot.slane %v3554_v8, %v1287_v22 }
  0x83   :  { %3271 = vmatprep.subr.msk.mxu0 %vm93_vm2, %v421_v39  ;;  %3274 = vmatprep.subr.msk.mxu1 %vm93_vm2, %v505_v41  ;;  %v3735_v41 = vld [vmem:[%s4054_s1 + $0x18] ss:$0 sm:$0xff] }
  0x84   :  { %v683_v51 = vrot.slane %v599_v46, 4  ;;  %v925_v55 = vpop.permute.xlu1 %924  ;;  %v923_v56 = vpop.permute.xlu0 %922  ;;  %v682_v57 = vrot.slane %v598_v52, 4 }
  0x85   :  { %v928_v60 = vsel %vm926_vm6, %v925_v55, %v923_v56  ;;  %v927_v11 = vsel %vm926_vm6, %v923_v56, %v925_v55 }
  0x86   :  { %3264 = vmatmul.mubr.msk.f32.vlgmr.msra.gmra.mrb[0].mxu0 %vm89_vm4, %v39_v47  ;;  %v938_v61 = vmul.f32 %v3651_v59, %v928_v60  ;;  %v937_v20 = vmul.f32 %v3672_v7, %v927_v11 }
  0x87   :  { %3272 = vmatpush1.msk.msra.mxu0 %vm93_vm2, %v420_v44  ;;  %495 = vmatprep.mubr.f32.mxu0 %v3442_v2  ;;  %v45_v44 = vld [vmem:[%s4055_s2 + $0x30] sm:$0xff] }
  0x88   :  { %3270 = vmatmul.mubr.msk.f32.vlgmr.msra.gmra.mrb[0].mxu1 %vm89_vm4, %v39_v47  ;;  %3277 = vmatprep.subr.msk.mxu0 %vm93_vm2, %v599_v46  ;;  %v1103_v3 = vpop.permute.xlu1 %1102  ;;  %v1101_v6 = vpop.permute.xlu0 %1100  ;;  %v1022_v12 = vrot.slane %v938_v61, 4  ;;  %v1021_v26 = vrot.slane %v937_v20, 4  ;;  %v3753_v46 = vld [vmem:[%s4054_s1 + $0x10] ss:$0 sm:$0xff] }
  0x89   :  { %3275 = vmatpush1.msk.msra.mxu1 %vm93_vm2, %v504_v48  ;;  %574 = vmatprep.mubr.f32.mxu1 %v3442_v2  ;;  %v1106_v18 = vsel %vm1104_vm7, %v1103_v3, %v1101_v6  ;;  %v1105_v28 = vsel %vm1104_vm7, %v1101_v6, %v1103_v3 }
  0x8a   :  { %3280 = vmatprep.subr.msk.mxu1 %vm93_vm2, %v683_v51  ;;  %v1116_v21 = vmul.f32 %v3679_v17, %v1106_v18  ;;  %v1115_v31 = vmul.f32 %v3701_v27, %v1105_v28  ;;  %v46_v51 = vld [vmem:[%s4055_s2 + $0x38] sm:$0xff]  ;;  %v3449_v28 = vmov 0  }
  0x8b   :  { %3408 = vset.pattern.permute.xlu1 %v3449_v28  ;;  %3409 = vset.pattern.permute.xlu0 %v3449_v28 }
  0x8c   :  { %v1281_v24 = vpop.permute.xlu1 %1280  ;;  %v1279_v25 = vpop.permute.xlu0 %1278  ;;  %v1200_v29 = vrot.slane %v1116_v21, 4  ;;  %v1199_v36 = vrot.slane %v1115_v31, 4 }
  0x8d   :  { %v1284_v30 = vsel %vm1282_vm8, %v1281_v24, %v1279_v25  ;;  %v1283_v38 = vsel %vm1282_vm8, %v1279_v25, %v1281_v24 }
  0x8e   :  { %3273 = vmatmul.mubr.msk.f32.vlgmr.msra.gmra.mrb[0].mxu0 %vm89_vm4, %v41_v54  ;;  %v1294_v9 = vmul.f32 %v3707_v4, %v1284_v30  ;;  %v1293_v8 = vmul.f32 %v3725_v37, %v1283_v38  ;;  %v1665_v38 = vld [vmem:[%s4057_s4] sm:$0xff] }
  0x8f   :  { %3278 = vmatpush1.msk.msra.mxu0 %vm93_vm2, %v598_v52  ;;  %673 = vmatprep.mubr.f32.mxu0 %v3442_v2 }
  0x90   :  { %3276 = vmatmul.mubr.msk.f32.vlgmr.msra.gmra.mrb[0].mxu1 %vm89_vm4, %v41_v54  ;;  %3283 = vmatprep.subr.msk.mxu0 %vm93_vm2, %v3513_v1  ;;  %v1459_v33 = vpop.permute.xlu1 %1458  ;;  %v1457_v34 = vpop.permute.xlu0 %1456  ;;  %v1378_v39 = vrot.slane %v1294_v9, 4  ;;  %v1377_v45 = vrot.slane %v1293_v8, 4 }
  0x91   :  { %3281 = vmatpush1.msk.msra.mxu1 %vm93_vm2, %v682_v57  ;;  %752 = vmatprep.mubr.f32.mxu1 %v3442_v2  ;;  %v1462_v42 = vsel %vm1460_vm9, %v1459_v33, %v1457_v34  ;;  %v1461_v47 = vsel %vm1460_vm9, %v1457_v34, %v1459_v33  ;;  %v1661_v33 = vld [vmem:[%s4056_s3] sm:$0xff] }
  0x92   :  { %3286 = vmatprep.subr.msk.mxu1 %vm93_vm2, %v844_v58  ;;  %v1472_v43 = vmul.f32 %v3735_v41, %v1462_v42  ;;  %v1471_v50 = vmul.f32 %v3753_v46, %v1461_v47 }
  0x94   :  { %v1556_v48 = vrot.slane %v1472_v43, 4  ;;  %v1555_v52 = vrot.slane %v1471_v50, 4 }
  0x96   :  { %3279 = vmatmul.mubr.msk.f32.vlgmr.msra.gmra.mrb[0].mxu0 %vm89_vm4, %v42_v63 }
  0x97   :  { %3284 = vmatpush1.msk.msra.mxu0 %vm93_vm2, %v3504_v0  ;;  %834 = vmatprep.mubr.f32.mxu0 %v3442_v2 }
  0x98   :  { %3282 = vmatmul.mubr.msk.f32.vlgmr.msra.gmra.mrb[0].mxu1 %vm89_vm4, %v42_v63  ;;  %3289 = vmatprep.subr.msk.mxu0 %vm93_vm2, %v938_v61 }
  0x99   :  { %913 = vmatprep.mubr.f32.mxu1 %v3442_v2  ;;  %3287 = vmatpush1.msk.msra.mxu1 %vm93_vm2, %v843_v10 }
  0x9a   :  { %3292 = vmatprep.subr.msk.mxu1 %vm93_vm2, %v1022_v12 }
  0x9e   :  { %3285 = vmatmul.mubr.msk.f32.vlgmr.msra.gmra.mrb[0].mxu0 %vm89_vm4, %v43_v23 }
  0x9f   :  { %3290 = vmatpush1.msk.msra.mxu0 %vm93_vm2, %v937_v20  ;;  %1012 = vmatprep.mubr.f32.mxu0 %v3442_v2 }
  0xa0   :  { %3288 = vmatmul.mubr.msk.f32.vlgmr.msra.gmra.mrb[0].mxu1 %vm89_vm4, %v43_v23  ;;  %3295 = vmatprep.subr.msk.mxu0 %vm93_vm2, %v1116_v21 }
  0xa1   :  { %3293 = vmatpush1.msk.msra.mxu1 %vm93_vm2, %v1021_v26  ;;  %1091 = vmatprep.mubr.f32.mxu1 %v3442_v2 }
  0xa2   :  { %3298 = vmatprep.subr.msk.mxu1 %vm93_vm2, %v1200_v29 }
  0xa6   :  { %3291 = vmatmul.mubr.msk.f32.vlgmr.msra.gmra.mrb[0].mxu0 %vm89_vm4, %v44_v32 }
  0xa7   :  { %3296 = vmatpush1.msk.msra.mxu0 %vm93_vm2, %v1115_v31  ;;  %1190 = vmatprep.mubr.f32.mxu0 %v3442_v2 }
  0xa8   :  { %3294 = vmatmul.mubr.msk.f32.vlgmr.msra.gmra.mrb[0].mxu1 %vm89_vm4, %v44_v32  ;;  %3301 = vmatprep.subr.msk.mxu0 %vm93_vm2, %v1294_v9 }
  0xa9   :  { %3299 = vmatpush1.msk.msra.mxu1 %vm93_vm2, %v1199_v36  ;;  %1269 = vmatprep.mubr.f32.mxu1 %v3442_v2 }
  0xaa   :  { %3304 = vmatprep.subr.msk.mxu1 %vm93_vm2, %v1378_v39 }
  0xae   :  { %3297 = vmatmul.mubr.msk.f32.vlgmr.msra.gmra.mrb[0].mxu0 %vm89_vm4, %v45_v44 }
  0xaf   :  { %3302 = vmatpush1.msk.msra.mxu0 %vm93_vm2, %v1293_v8  ;;  %1368 = vmatprep.mubr.f32.mxu0 %v3442_v2 }
  0xb0   :  { %3300 = vmatmul.mubr.msk.f32.vlgmr.msra.gmra.mrb[0].mxu1 %vm89_vm4, %v45_v44  ;;  %3309 = vmatprep.subr.msk.mxu0 %vm93_vm2, %v1472_v43 }
  0xb1   :  { %3305 = vmatpush1.msk.msra.mxu1 %vm93_vm2, %v1377_v45  ;;  %1447 = vmatprep.mubr.f32.mxu1 %v3442_v2 }
  0xb2   :  { %3312 = vmatprep.subr.msk.mxu1 %vm93_vm2, %v1556_v48 }
  0xb6   :  { %3303 = vmatmul.mubr.msk.f32.vlgmr.msra.gmra.mrb[0].mxu0 %vm89_vm4, %v46_v51 }
  0xb7   :  { %3310 = vmatpush1.msk.msra.mxu0 %vm93_vm2, %v1471_v50  ;;  %1546 = vmatprep.mubr.f32.mxu0 %v3442_v2 }
  0xb8   :  { %3306 = vmatmul.mubr.msk.f32.vlgmr.msra.gmra.mrb[0].mxu1 %vm89_vm4, %v46_v51 }
  0xb9   :  { %3313 = vmatpush1.msk.msra.mxu1 %vm93_vm2, %v1555_v52  ;;  %1625 = vmatprep.mubr.f32.mxu1 %v3442_v2 }
  0xbe   :  { %3311 = vmatmul.mubr.msk.f32.vlgmr.msra.gmra.mrb[0].mxu0 %vm89_vm4, %v47_v53 }
  0xbf   :  { %1799 = vmatprep.mubr.f32.mxu0 %v3442_v2 }
  0xc0   :  { %3314 = vmatmul.mubr.msk.f32.vlgmr.msra.gmra.mrb[0].mxu1 %vm89_vm4, %v47_v53 }
  0xc1   :  { %1943 = vmatprep.mubr.f32.mxu1 %v3442_v2 }
 0x191   :  { %v1548_v54 = vpop.f32.mrb[0].mxu0 }
 0x192   :  { %v1550_v55 = vpop.f32.mrb[1].mxu0 }
 0x193   :  { %v1627_v56 = vpop.f32.mrb[0].mxu1  ;;  %v1634_v57 = vadd.f32 %v1550_v55, %v1548_v54 }
 0x194   :  { %v1629_v60 = vpop.f32.mrb[1].mxu1 }
 0x195   :  { %1635 = vadd.xlane.f32.xlu0 %v1634_v57  ;;  %v1638_v61 = vadd.f32 %v1629_v60, %v1627_v56 }
 0x197   :  { %1639 = vadd.xlane.f32.xlu1 %v1638_v61 }
 0x222   :  { %v1636_v62 = vpop.xlane.xlu0 %1635 }
 0x224   :  { %v1640_v63 = vpop.xlane.xlu1 %1639 }
 0x225   :  { %v1641_v3 = vadd.f32 %v1640_v63, %v1636_v62 }
 0x227   :  { %v1643_v6 = vmul.f32 0.001953125, %v1641_v3  ;;  %v3160_v3 = vld [vmem:[%s4059_s6] sm:$0xf] }
 0x229   :  { %v1644_v11 = vsub.f32 %v1548_v54, %v1643_v6  ;;  %v1645_v12 = vsub.f32 %v1550_v55, %v1643_v6  ;;  %v1652_v18 = vsub.f32 %v1627_v56, %v1643_v6  ;;  %v1653_v20 = vsub.f32 %v1629_v60, %v1643_v6 }
 0x22b   :  { %v1646_v21 = vmul.f32 %v1644_v11, %v1644_v11  ;;  %v1647_v22 = vmul.f32 %v1645_v12, %v1645_v12  ;;  %v1654_v23 = vmul.f32 %v1652_v18, %v1652_v18  ;;  %v1655_v24 = vmul.f32 %v1653_v20, %v1653_v20  ;;  %v48_v20 = vld [vmem:[%s4058_s5] sm:$0xff] }
 0x22c   :  { %v1731_v28 = vrot.slane %v48_v20, 4 }
 0x22d   :  { %v1648_v25 = vadd.f32 %v1647_v22, %v1646_v21  ;;  %v1656_v26 = vadd.f32 %v1655_v24, %v1654_v23 }
 0x22f   :  { %1649 = vadd.xlane.f32.xlu0 %v1648_v25 }
 0x233   :  { %1657 = vadd.xlane.f32.xlu0 %v1656_v26 }
 0x2bc   :  { %v1650_v29 = vpop.xlane.xlu0 %1649 }
 0x2c0   :  { %v1658_v30 = vpop.xlane.xlu0 %1657 }
 0x2c1   :  { %v1659_v31 = vadd.f32 %v1658_v30, %v1650_v29 }
 0x2c3   :  { %v1660_v9 = vmul.f32 0.001953125, %v1659_v31 }
 0x2c5   :  { %v1662_v32 = vadd.f32 1e-05, %v1660_v9 }
 0x2c7   :  { %3410 = vrsqrt.f32 %v1662_v32 }
 0x2d1   :  { %v3411_v34 = vpop.eup %3410 }
 0x2d2   :  { %v1664_v36 = vmul.f32 %v3411_v34, %v1661_v33 }
 0x2d4   :  { %1670 = vperm.xlu1 %3408, %v1664_v36   ;;  %v1666_v39 = vmul.f32 %v1664_v36, %v1643_v6 }
 0x2d6   :  { %v1667_v42 = vsub.f32 %v1665_v38, %v1666_v39 }
 0x2d8   :  { %1677 = vperm.xlu0 %3409, %v1667_v42  }
 0x353   :  { %v1671_v8 = vpop.permute.xlu1 %1670 }
 0x354   :  { %v1673_v43 = vmul.f32 %v1671_v8, %v1548_v54  ;;  %v1674_v44 = vmul.f32 %v1671_v8, %v1550_v55  ;;  %v1688_v45 = vmul.f32 %v1671_v8, %v1627_v56  ;;  %v1689_v54 = vmul.f32 %v1671_v8, %v1629_v60 }
 0x357   :  { %v1678_v47 = vpop.permute.xlu0 %1677 }
 0x358   :  { %v1680_v48 = vadd.f32 %v1678_v47, %v1673_v43  ;;  %v1681_v50 = vadd.f32 %v1678_v47, %v1674_v44  ;;  %v1690_v51 = vadd.f32 %v1688_v45, %v1678_v47  ;;  %v1691_v56 = vadd.f32 %v1689_v54, %v1678_v47 }
 0x35a   :  { %vm1682_vm10 = vcmp.gt.f32.partialorder %v1680_v48, 0.0  ;;  %v1684_v52 = vmul.f32 0.2, %v1680_v48  ;;  %v1685_v53 = vmul.f32 0.2, %v1681_v50  ;;  %vm1683_vm11 = vcmp.gt.f32.partialorder %v1681_v50, 0.0 }
 0x35b   :  { %v1694_v61 = vmul.f32 0.2, %v1690_v51  ;;  %vm1692_vm12 = vcmp.gt.f32.partialorder %v1690_v51, 0.0  ;;  %v1695_v63 = vmul.f32 0.2, %v1691_v56  ;;  %vm1693_vm13 = vcmp.gt.f32.partialorder %v1691_v56, 0.0 }
 0x35c   :  { %v3787_v57 = vsel %vm1682_vm10, %v1680_v48, %v1684_v52  ;;  %v3793_v55 = vsel %vm1683_vm11, %v1681_v50, %v1685_v53 }
 0x35d   :  { %2021 = vrot.lane.b32.xlu0 %v3787_v57, %s3443_s15  ;;  %1714 = vrot.lane.b32.xlu1 %v3787_v57, %s3440_s11  ;;  %v3795_v62 = vsel %vm1692_vm12, %v1690_v51, %v1694_v61  ;;  %v3805_v60 = vsel %vm1693_vm13, %v1691_v56, %v1695_v63 }
 0x361   :  { %2025 = vrot.lane.b32.xlu0 %v3793_v55, %s3443_s15  ;;  %1716 = vrot.lane.b32.xlu1 %v3795_v62, %s3440_s11 }
 0x365   :  { %2186 = vrot.lane.b32.xlu0 %v3787_v57, %s3444_s16  ;;  %1718 = vrot.lane.b32.xlu1 %v3793_v55, %s3440_s11 }
 0x369   :  { %2190 = vrot.lane.b32.xlu0 %v3793_v55, %s3444_s16  ;;  %1720 = vrot.lane.b32.xlu1 %v3805_v60, %s3440_s11 }
 0x36d   :  { %2500 = vrot.lane.b32.xlu0 %v3787_v57, %s3445_s17  ;;  %1698 = vrot.lane.b32.xlu1 %v3787_v57, %s3441_s12 }
 0x371   :  { %2504 = vrot.lane.b32.xlu0 %v3793_v55, %s3445_s17  ;;  %1700 = vrot.lane.b32.xlu1 %v3795_v62, %s3441_s12 }
 0x375   :  { %2665 = vrot.lane.b32.xlu0 %v3787_v57, %s3446_s18  ;;  %1702 = vrot.lane.b32.xlu1 %v3793_v55, %s3441_s12 }
 0x379   :  { %2669 = vrot.lane.b32.xlu0 %v3793_v55, %s3446_s18  ;;  %1704 = vrot.lane.b32.xlu1 %v3805_v60, %s3441_s12 }
 0x37d   :  { %2830 = vrot.lane.b32.xlu0 %v3787_v57, %s3447_s19  ;;  %2023 = vrot.lane.b32.xlu1 %v3795_v62, %s3443_s15 }
 0x381   :  { %2834 = vrot.lane.b32.xlu0 %v3793_v55, %s3447_s19  ;;  %2027 = vrot.lane.b32.xlu1 %v3805_v60, %s3443_s15 }
 0x385   :  { %2995 = vrot.lane.b32.xlu0 %v3787_v57, %s3448_s20  ;;  %2188 = vrot.lane.b32.xlu1 %v3795_v62, %s3444_s16 }
 0x389   :  { %2999 = vrot.lane.b32.xlu0 %v3793_v55, %s3448_s20  ;;  %2192 = vrot.lane.b32.xlu1 %v3805_v60, %s3444_s16 }
 0x38d   :  { %3163 = vperm.xlu0 %3409, %v3160_v3   ;;  %2502 = vrot.lane.b32.xlu1 %v3795_v62, %s3445_s17 }
 0x391   :  { %2506 = vrot.lane.b32.xlu1 %v3805_v60, %s3445_s17 }
 0x395   :  { %2667 = vrot.lane.b32.xlu1 %v3795_v62, %s3446_s18 }
 0x399   :  { %2671 = vrot.lane.b32.xlu1 %v3805_v60, %s3446_s18 }
 0x39d   :  { %2832 = vrot.lane.b32.xlu1 %v3795_v62, %s3447_s19 }
 0x3a1   :  { %2836 = vrot.lane.b32.xlu1 %v3805_v60, %s3447_s19 }
 0x3a5   :  { %2997 = vrot.lane.b32.xlu1 %v3795_v62, %s3448_s20 }
 0x3a9   :  { %3001 = vrot.lane.b32.xlu1 %v3805_v60, %s3448_s20 }
 0x3cf   :  { %v2022_v6 = vpop.permute.xlu0 %2021  ;;  %v1715_v11 = vpop.permute.xlu1 %1714 }
 0x3d3   :  { %v2026_v12 = vpop.permute.xlu0 %2025  ;;  %v1717_v18 = vpop.permute.xlu1 %1716 }
 0x3d4   :  { %v2029_v42 = vsel %vm409_vm3, %v2022_v6, %v2026_v12  ;;  %v2031_v44 = vsel %vm409_vm3, %v2026_v12, %v2022_v6 }
 0x3d5   :  { %v2034_v50 = vmul.f32 %v2029_v42, %v3578_v19  ;;  %v2033_v53 = vmul.f32 %v2031_v44, %v3599_v35 }
 0x3d7   :  { %v1719_v21 = vpop.permute.xlu1 %1718  ;;  %v2187_v24 = vpop.permute.xlu0 %2186 }
 0x3d8   :  { %v1722_v22 = vsel %vm76_vm0, %v1715_v11, %v1719_v21  ;;  %v1724_v23 = vsel %vm76_vm0, %v1719_v21, %v1715_v11 }
 0x3d9   :  { %v1726_v25 = vmul.f32 %v1724_v23, %v3565_v13  ;;  %v1727_v26 = vmul.f32 %v1722_v22, %v3574_v16 }
 0x3db   :  { %1735 = vmatprep.subr.mxu0 %v1727_v26  ;;  %v1721_v29 = vpop.permute.xlu1 %1720  ;;  %v2191_v33 = vpop.permute.xlu0 %2190 }
 0x3dc   :  { %v1723_v30 = vsel %vm76_vm0, %v1717_v18, %v1721_v29  ;;  %v1725_v31 = vsel %vm76_vm0, %v1721_v29, %v1717_v18  ;;  %1736 = vmatpush1.msra.mxu0 %v1726_v25  ;;  %v2194_v45 = vsel %vm587_vm5, %v2187_v24, %v2191_v33  ;;  %v2196_v3 = vsel %vm587_vm5, %v2191_v33, %v2187_v24 }
 0x3dd   :  { %v1728_v9 = vmul.f32 %v1725_v31, %v3565_v13  ;;  %v1729_v32 = vmul.f32 %v1723_v30, %v3574_v16  ;;  %3315 = vmatmul.mubr.msk.f32.vlgmr.msra.gmra.mrb[2].mxu0 %vm1732_vm14, %v1731_v28  ;;  %v2199_v56 = vmul.f32 %v2194_v45, %v3610_v40  ;;  %v2198_v11 = vmul.f32 %v2196_v3, %v3630_v49 }
 0x3de   :  { %1872 = vmatprep.mubr.f32.mxu0 %v3442_v2 }
 0x3df   :  { %1879 = vmatprep.subr.mxu1 %v1729_v32  ;;  %v1699_v34 = vpop.permute.xlu1 %1698  ;;  %v3881_v38 = vpop.permute.xlu0 %2500 }
 0x3e0   :  { %1880 = vmatpush1.msra.mxu1 %v1728_v9 }
 0x3e1   :  { %3317 = vmatmul.mubr.msk.f32.vlgmr.msra.gmra.mrb[2].mxu1 %vm1732_vm14, %v1731_v28 }
 0x3e2   :  { %2014 = vmatprep.mubr.f32.mxu1 %v3442_v2 }
 0x3e3   :  { %v1701_v36 = vpop.permute.xlu1 %1700  ;;  %v2505_v47 = vpop.permute.xlu0 %2504 }
 0x3e4   :  { %v2508_v9 = vsel %vm926_vm6, %v3881_v38, %v2505_v47 }
 0x3e5   :  { %v2512_v33 = vmul.f32 %v2508_v9, %v3672_v7 }
 0x3e7   :  { %v1703_v39 = vpop.permute.xlu1 %1702  ;;  %v2666_v6 = vpop.permute.xlu0 %2665 }
 0x3e8   :  { %v1706_v13 = vsel %vm59_vm1, %v1699_v34, %v1703_v39  ;;  %v1708_v16 = vsel %vm59_vm1, %v1703_v39, %v1699_v34 }
 0x3e9   :  { %v1710_v8 = vmul.f32 %v1708_v16, %v3568_v14  ;;  %v1711_v43 = vmul.f32 %v1706_v13, %v3571_v15 }
 0x3eb   :  { %1808 = vmatprep.subr.mxu0 %v1711_v43  ;;  %v1705_v48 = vpop.permute.xlu1 %1704 }
 0x3ec   :  { %v1707_v51 = vsel %vm59_vm1, %v1701_v36, %v1705_v48  ;;  %v1709_v52 = vsel %vm59_vm1, %v1705_v48, %v1701_v36  ;;  %1809 = vmatpush1.msra.mxu0 %v1710_v8 }
 0x3ed   :  { %v1712_v61 = vmul.f32 %v1709_v52, %v3568_v14  ;;  %v1713_v54 = vmul.f32 %v1707_v51, %v3571_v15  ;;  %3316 = vmatmul.mubr.msk.f32.vlgmr.msra.gmra.mrb[2].mxu0 %vm1732_vm14, %v48_v20  ;;  %2040 = vmatprep.subr.mxu0 %v2034_v50  ;;  %v49_v14 = vld [vmem:[%s4058_s5 + $0x8] sm:$0xff] }
 0x3ee   :  { %2104 = vmatprep.mubr.f32.mxu0 %v3442_v2  ;;  %2041 = vmatpush1.msra.mxu0 %v2033_v53  ;;  %v2202_v24 = vrot.slane %v49_v14, 4 }
 0x3ef   :  { %1950 = vmatprep.subr.mxu1 %v1713_v54  ;;  %v2024_v63 = vpop.permute.xlu1 %2023  ;;  %2205 = vmatprep.subr.mxu0 %v2199_v56 }
 0x3f0   :  { %1951 = vmatpush1.msra.mxu1 %v1712_v61 }
 0x3f1   :  { %3318 = vmatmul.mubr.msk.f32.vlgmr.msra.gmra.mrb[2].mxu1 %vm1732_vm14, %v48_v20  ;;  %v2670_v20 = vpop.permute.xlu0 %2669 }
 0x3f2   :  { %2177 = vmatprep.mubr.f32.mxu1 %v3442_v2  ;;  %v2673_v13 = vsel %vm1104_vm7, %v2666_v6, %v2670_v20 }
 0x3f3   :  { %v2028_v15 = vpop.permute.xlu1 %2027  ;;  %v2677_v43 = vmul.f32 %v2673_v13, %v3701_v27 }
 0x3f4   :  { %v2030_v12 = vsel %vm409_vm3, %v2024_v63, %v2028_v15  ;;  %v2032_v18 = vsel %vm409_vm3, %v2028_v15, %v2024_v63 }
 0x3f5   :  { %v2035_v21 = vmul.f32 %v2032_v18, %v3599_v35  ;;  %v2036_v22 = vmul.f32 %v2030_v12, %v3578_v19  ;;  %3319 = vmatmul.mubr.msk.f32.vlgmr.msra.gmra.mrb[2].mxu0 %vm1732_vm14, %v49_v14  ;;  %v2510_v35 = vsel %vm926_vm6, %v2505_v47, %v3881_v38  ;;  %v2831_v28 = vpop.permute.xlu0 %2830 }
 0x3f6   :  { %2206 = vmatpush1.msra.mxu0 %v2198_v11  ;;  %2269 = vmatprep.mubr.f32.mxu0 %v3442_v2 }
 0x3f7   :  { %2354 = vmatprep.subr.mxu0 %v3793_v55  ;;  %2113 = vmatprep.subr.mxu1 %v2036_v22  ;;  %v2189_v23 = vpop.permute.xlu1 %2188  ;;  %v2513_v55 = vmul.f32 %v2510_v35, %v3651_v59 }
 0x3f8   :  { %2114 = vmatpush1.msra.mxu1 %v2035_v21 }
 0x3f9   :  { %3320 = vmatmul.mubr.msk.f32.vlgmr.msra.gmra.mrb[2].mxu1 %vm1732_vm14, %v49_v14 }
 0x3fa   :  { %2342 = vmatprep.mubr.f32.mxu1 %v3442_v2 }
 0x3fb   :  { %v2193_v19 = vpop.permute.xlu1 %2192 }
 0x3fc   :  { %v2195_v25 = vsel %vm587_vm5, %v2189_v23, %v2193_v19  ;;  %v2197_v26 = vsel %vm587_vm5, %v2193_v19, %v2189_v23 }
 0x3fd   :  { %v2200_v29 = vmul.f32 %v2197_v26, %v3630_v49  ;;  %v2201_v30 = vmul.f32 %v2195_v25, %v3610_v40  ;;  %3321 = vmatmul.mubr.msk.f32.vlgmr.msra.gmra.mrb[2].mxu0 %vm1732_vm14, %v2202_v24  ;;  %v2675_v40 = vsel %vm1104_vm7, %v2670_v20, %v2666_v6  ;;  %v50_v49 = vld [vmem:[%s4058_s5 + $0x10] sm:$0xff]  ;;  %v52_v20 = vld [vmem:[%s4058_s5 + $0x20] sm:$0xf] }
 0x3fe   :  { %2355 = vmatpush1.msra.mxu0 %v3787_v57  ;;  %2418 = vmatprep.mubr.f32.mxu0 %v3442_v2  ;;  %v2835_v57 = vpop.permute.xlu0 %2834  ;;  %v2516_v42 = vrot.slane %v50_v49, 4 }
 0x3ff   :  { %2519 = vmatprep.subr.mxu0 %v2513_v55  ;;  %2278 = vmatprep.subr.mxu1 %v2201_v30  ;;  %v2503_v31 = vpop.permute.xlu1 %2502  ;;  %v2838_v52 = vsel %vm1282_vm8, %v2831_v28, %v2835_v57 }
 0x400   :  { %2279 = vmatpush1.msra.mxu1 %v2200_v29  ;;  %v2842_v54 = vmul.f32 %v2838_v52, %v3725_v37 }
 0x401   :  { %3322 = vmatmul.mubr.msk.f32.vlgmr.msra.gmra.mrb[2].mxu1 %vm1732_vm14, %v2202_v24  ;;  %2427 = vmatprep.subr.mxu1 %v3805_v60  ;;  %v2678_v60 = vmul.f32 %v2675_v40, %v3679_v17 }
 0x402   :  { %2428 = vmatpush1.msra.mxu1 %v3795_v62  ;;  %2491 = vmatprep.mubr.f32.mxu1 %v3442_v2  ;;  %v2996_v16 = vpop.permute.xlu0 %2995 }
 0x403   :  { %v2507_v32 = vpop.permute.xlu1 %2506 }
 0x404   :  { %v2511_v34 = vsel %vm926_vm6, %v2507_v32, %v2503_v31  ;;  %v2509_v36 = vsel %vm926_vm6, %v2503_v31, %v2507_v32 }
 0x405   :  { %v2515_v62 = vmul.f32 %v2511_v34, %v3651_v59  ;;  %3323 = vmatmul.mubr.msk.f32.vlgmr.msra.gmra.mrb[2].mxu0 %vm1732_vm14, %v50_v49  ;;  %v2514_v39 = vmul.f32 %v2509_v36, %v3672_v7  ;;  %v2840_v59 = vsel %vm1282_vm8, %v2835_v57, %v2831_v28 }
 0x406   :  { %2520 = vmatpush1.msra.mxu0 %v2512_v33  ;;  %2583 = vmatprep.mubr.f32.mxu0 %v3442_v2  ;;  %v2843_v7 = vmul.f32 %v2840_v59, %v3707_v4  ;;  %v3000_v48 = vpop.permute.xlu0 %2999 }
 0x407   :  { %2684 = vmatprep.subr.mxu0 %v2678_v60  ;;  %2592 = vmatprep.subr.mxu1 %v2515_v62  ;;  %v2668_v38 = vpop.permute.xlu1 %2667  ;;  %v3005_v53 = vsel %vm1460_vm9, %v3000_v48, %v2996_v16  ;;  %v3003_v15 = vsel %vm1460_vm9, %v2996_v16, %v3000_v48 }
 0x408   :  { %v3008_v56 = vmul.f32 %v3735_v41, %v3005_v53  ;;  %v3007_v12 = vmul.f32 %v3753_v46, %v3003_v15  ;;  %v3208_v53 = vld [vmem:[%s4061_s8] sm:$0xf] }
 0x409   :  { %3324 = vmatmul.mubr.msk.f32.vlgmr.msra.gmra.mrb[2].mxu1 %vm1732_vm14, %v50_v49 }
 0x40a   :  { %2593 = vmatpush1.msra.mxu1 %v2514_v39  ;;  %2656 = vmatprep.mubr.f32.mxu1 %v3442_v2 }
 0x40b   :  { %v2672_v8 = vpop.permute.xlu1 %2671 }
 0x40c   :  { %v2676_v44 = vsel %vm1104_vm7, %v2672_v8, %v2668_v38  ;;  %v2674_v45 = vsel %vm1104_vm7, %v2668_v38, %v2672_v8  ;;  %v3164_v5 = vpop.permute.xlu0 %3163 }
 0x40d   :  { %v2680_v47 = vmul.f32 %v2676_v44, %v3679_v17  ;;  %3325 = vmatmul.mubr.msk.f32.vlgmr.msra.gmra.mrb[2].mxu0 %vm1732_vm14, %v2516_v42  ;;  %v2679_v51 = vmul.f32 %v2674_v45, %v3701_v27  ;;  %v51_v17 = vld [vmem:[%s4058_s5 + $0x18] sm:$0xff] }
 0x40e   :  { %2685 = vmatpush1.msra.mxu0 %v2677_v43  ;;  %2748 = vmatprep.mubr.f32.mxu0 %v3442_v2  ;;  %v2846_v11 = vrot.slane %v51_v17, 4 }
 0x40f   :  { %2849 = vmatprep.subr.mxu0 %v2843_v7  ;;  %2757 = vmatprep.subr.mxu1 %v2680_v47  ;;  %v2833_v50 = vpop.permute.xlu1 %2832 }
 0x411   :  { %3326 = vmatmul.mubr.msk.f32.vlgmr.msra.gmra.mrb[2].mxu1 %vm1732_vm14, %v2516_v42 }
 0x412   :  { %2758 = vmatpush1.msra.mxu1 %v2679_v51  ;;  %2821 = vmatprep.mubr.f32.mxu1 %v3442_v2 }
 0x413   :  { %v2837_v61 = vpop.permute.xlu1 %2836 }
 0x414   :  { %v2841_v27 = vsel %vm1282_vm8, %v2837_v61, %v2833_v50  ;;  %v2839_v63 = vsel %vm1282_vm8, %v2833_v50, %v2837_v61  ;;  %v3204_v50 = vld [vmem:[%s4060_s7] sm:$0xf]  ;;  %s3450_s7 = smov [#allocation2]  }
 0x415   :  { %v2845_v3 = vmul.f32 %v2841_v27, %v3707_v4  ;;  %3327 = vmatmul.mubr.msk.f32.vlgmr.msra.gmra.mrb[2].mxu0 %vm1732_vm14, %v51_v17  ;;  %v2844_v14 = vmul.f32 %v2839_v63, %v3725_v37  ;;  %s3251_s8 = sshll.u32 %s3450_s7, 4  ;;  %s3252_s8 = int_to_ptr.vmem [resolvable:$true] %s3251_s8 }
 0x416   :  { %2850 = vmatpush1.msra.mxu0 %v2842_v54  ;;  %2913 = vmatprep.mubr.f32.mxu0 %v3442_v2  ;;  %s3416_s30 = scalar_lea.vmem %s3252_s8, 256  ;;  %p3421_p1 = scmp.lt.s32.totalorder %s3252_s8, %s3252_s8 }
 0x417   :  { %3014 = vmatprep.subr.mxu0 %v3008_v56  ;;  %2922 = vmatprep.subr.mxu1 %v2845_v3  ;;  %v2998_v6 = vpop.permute.xlu1 %2997  ;;  %p3417_p0 = scmp.ne.s32.totalorder %s3252_s8, %s3416_s30  ;;  %p3422_p2 = scmp.lt.s32.totalorder %s3416_s30, %s3416_s30 }
 0x419   :  { %3328 = vmatmul.mubr.msk.f32.vlgmr.msra.gmra.mrb[2].mxu1 %vm1732_vm14, %v51_v17  ;;  %p3423_p3 = por %p3422_p2, %p3421_p1 }
 0x41a   :  { %2923 = vmatpush1.msra.mxu1 %v2844_v14  ;;  %2986 = vmatprep.mubr.f32.mxu1 %v3442_v2 }
 0x41b   :  { %v3002_v4 = vpop.permute.xlu1 %3001  ;;  %p3424_p4 = pnand %p3423_p3, %p3417_p0 }
 0x41c   :  { %v3006_v18 = vsel %vm1460_vm9, %v3002_v4, %v2998_v6  ;;  %v3004_v21 = vsel %vm1460_vm9, %v2998_v6, %v3002_v4 }
 0x41d   :  { %v3010_v37 = vmul.f32 %v3735_v41, %v3006_v18  ;;  %3329 = vmatmul.mubr.msk.f32.vlgmr.msra.gmra.mrb[2].mxu0 %vm1732_vm14, %v2846_v11  ;;  %v3009_v22 = vmul.f32 %v3753_v46, %v3004_v21  ;;  %v3414_v21 = vld [vmem:[%s4053_s0] sm:$0xff] }
 0x41e   :  { %3015 = vmatpush1.msra.mxu0 %v3007_v12  ;;  %3078 = vmatprep.mubr.f32.mxu0 %v3442_v2 }
 0x41f   :  { %3087 = vmatprep.subr.mxu1 %v3010_v37 }
 0x421   :  { %3330 = vmatmul.mubr.msk.f32.vlgmr.msra.gmra.mrb[2].mxu1 %vm1732_vm14, %v2846_v11 }
 0x422   :  { %3088 = vmatpush1.msra.mxu1 %v3009_v22  ;;  %3151 = vmatprep.mubr.f32.mxu1 %v3442_v2  ;;  %v3415_v22 = vld [vmem:[%s4053_s0 + $0x8] sm:$0xff] }
 0x425   :  { %3331 = vmatmul.mubr.msk.f32.vlgmr.msra.gmra.mrb[2].mxu0 %vm1732_vm14, %v52_v20 }
 0x429   :  { %3332 = vmatmul.mubr.msk.f32.vlgmr.msra.gmra.mrb[2].mxu1 %vm1732_vm14, %v52_v20 }
 0x4f8   :  { %v3080_v41 = vpop.f32.mrb[2].mxu0 }
 0x4f9   :  { %v3166_v23 = vadd.f32 %v3164_v5, %v3080_v41  ;;  %v3082_v24 = vpop.f32.mrb[3].mxu0 }
 0x4fa   :  { %v3167_v35 = vadd.f32 %v3164_v5, %v3082_v24 }
 0x4fb   :  { %v3170_v46 = vsel %vm93_vm2, %v3166_v23, 0.0 }
 0x4fc   :  { %v3153_v19 = vpop.f32.mrb[2].mxu1  ;;  %v3171_v25 = vsel %vm93_vm2, %v3167_v35, 0.0 }
 0x4fd   :  { %v3168_v26 = vadd.f32 %v3164_v5, %v3153_v19  ;;  %v3155_v55 = vpop.f32.mrb[3].mxu1  ;;  %v3172_v28 = vadd.f32 %v3171_v25, %v3170_v46 }
 0x4fe   :  { %v3169_v29 = vadd.f32 %v3164_v5, %v3155_v55 }
 0x4ff   :  { %3173 = vadd.xlane.f32.xlu1 %v3172_v28  ;;  %v3176_v2 = vsel %vm93_vm2, %v3168_v26, 0.0 }
 0x500   :  { %v3177_v30 = vsel %vm93_vm2, %v3169_v29, 0.0 }
 0x501   :  { %v3178_v31 = vadd.f32 %v3177_v30, %v3176_v2 }
 0x503   :  { %3179 = vadd.xlane.f32.xlu0 %v3178_v31 }
 0x58c   :  { %v3174_v9 = vpop.xlane.xlu1 %3173 }
 0x590   :  { %v3180_v40 = vpop.xlane.xlu0 %3179 }
 0x591   :  { %v3181_v49 = vadd.f32 %v3180_v40, %v3174_v9 }
 0x593   :  { %v3182_v57 = vmul.f32 0.001953125, %v3181_v49 }
 0x595   :  { %v3193_v32 = vsub.f32 %v3168_v26, %v3182_v57  ;;  %v3194_v33 = vsub.f32 %v3169_v29, %v3182_v57  ;;  %v3183_v34 = vsub.f32 %v3166_v23, %v3182_v57  ;;  %v3184_v60 = vsub.f32 %v3167_v35, %v3182_v57 }
 0x597   :  { %v3195_v36 = vmul.f32 %v3193_v32, %v3193_v32  ;;  %v3196_v62 = vmul.f32 %v3194_v33, %v3194_v33  ;;  %v3185_v38 = vmul.f32 %v3183_v34, %v3183_v34  ;;  %v3186_v39 = vmul.f32 %v3184_v60, %v3184_v60 }
 0x599   :  { %v3197_v13 = vsel %vm93_vm2, %v3195_v36, 0.0  ;;  %v3198_v16 = vsel %vm93_vm2, %v3196_v62, 0.0  ;;  %v3187_v42 = vsel %vm93_vm2, %v3185_v38, 0.0  ;;  %v3188_v59 = vsel %vm93_vm2, %v3186_v39, 0.0 }
 0x59a   :  { %v3199_v8 = vadd.f32 %v3198_v16, %v3197_v13  ;;  %v3189_v43 = vadd.f32 %v3188_v59, %v3187_v42 }
 0x59c   :  { %3200 = vadd.xlane.f32.xlu1 %v3199_v8  ;;  %3190 = vadd.xlane.f32.xlu0 %v3189_v43 }
 0x629   :  { %v3201_v44 = vpop.xlane.xlu1 %3200  ;;  %v3191_v7 = vpop.xlane.xlu0 %3190 }
 0x62a   :  { %v3202_v45 = vadd.f32 %v3201_v44, %v3191_v7 }
 0x62c   :  { %v3203_v47 = vmul.f32 0.001953125, %v3202_v45 }
 0x62e   :  { %v3205_v48 = vadd.f32 1e-05, %v3203_v47 }
 0x630   :  { %3412 = vrsqrt.f32 %v3205_v48 }
 0x63a   :  { %v3413_v51 = vpop.eup %3412 }
 0x63b   :  { %v3207_v52 = vmul.f32 %v3413_v51, %v3204_v50 }
 0x63d   :  { %3213 = vperm.xlu0 %3409, %v3207_v52   ;;  %v3209_v17 = vmul.f32 %v3207_v52, %v3182_v57 }
 0x63f   :  { %v3210_v61 = vsub.f32 %v3208_v53, %v3209_v17 }
 0x641   :  { %3220 = vperm.xlu1 %3408, %v3210_v61  }
 0x6bc   :  { %v3214_v54 = vpop.permute.xlu0 %3213 }
 0x6bd   :  { %v3216_v27 = vmul.f32 %v3214_v54, %v3166_v23  ;;  %v3217_v56 = vmul.f32 %v3214_v54, %v3167_v35  ;;  %v3227_v63 = vmul.f32 %v3214_v54, %v3168_v26  ;;  %v3228_v3 = vmul.f32 %v3214_v54, %v3169_v29 }
 0x6c0   :  { %v3221_v6 = vpop.permute.xlu1 %3220 }
 0x6c1   :  { %v3223_v14 = vadd.f32 %v3221_v6, %v3216_v27  ;;  %v3224_v15 = vadd.f32 %v3221_v6, %v3217_v56  ;;  %v3229_v11 = vadd.f32 %v3227_v63, %v3221_v6  ;;  %v3230_v4 = vadd.f32 %v3228_v3, %v3221_v6 }
 0x6c3   :  { %v3233_v12 = vadd.f32 %v3229_v11, %v843_v10  ;;  %v3234_v18 = vadd.f32 %v3230_v4, %v844_v58  ;;  %v3225_v37 = vadd.f32 %v3414_v21, %v3223_v14  ;;  %v3226_v20 = vadd.f32 %v3415_v22, %v3224_v15 }
 0x6c5   :  { %v3237_v5 = vrot.slane %v3233_v12, 4  ;;  %v3238_v41 = vrot.slane %v3234_v18, 4 }
 0x6c7   :  { %v3241_v0 = vsel %vm93_vm2, %v3225_v37, %v3237_v5  ;;  %v3242_v1 = vsel %vm93_vm2, %v3226_v20, %v3238_v41 }
 0x6c8   :  { %3243 = vst [vmem:[#allocation2] sm:$0xff] %v3241_v0  ;;  %3244 = vst [vmem:[#allocation2 + $0x8] sm:$0xff] %v3242_v1 }
 0x6c9   :  { %3427 = shalt.err (!%p3424_p4)
}
 0x6ca   :  { %s3428_s0 = scalar_lea.hbm %s4062_s9, 256 }
 0x6cb   :  { %p3429_p5 = scmp.ne.s32.totalorder %s4062_s9, %s3428_s0  ;;  %p3432_p6 = scmp.lt.u32.totalorder %s3428_s0, %s4062_s9 }
 0x6cd   :  { %p3434_p7 = pnand %p3432_p6, %p3429_p5 }
 0x6cf   :  { %3437 = shalt.err (!%p3434_p7)
}
 0x6d0   :  { %3254 = dma.vmem_to_hbm [thread:$0]  %s3252_s8, 256, %s4062_s9, [#allocation3]  }
 0x6d1   :  { %3438 = dma.done.wait [#allocation3], 256  }
 0x6d2   :  { %3439 = vsyncadd [#allocation3], 4294967040 }
 0x6d3   :  { %3258 = vsyncpa [#allocation3], 1 }

</bundles_post_ra>
